<compile_context>
chip_gen: v7x
topology: tpu7x:2x2x1
jax: 0.10.0
libtpu: 0.0.40
codegen_flags: <defaults>
</compile_context>

<pallas_src>
import functools

import jax
import jax.numpy as jnp
from jax.experimental import pallas as pl
from jax.experimental.pallas import tpu as pltpu


_VMEM_LIMIT_BYTES = 48 * 1024 * 1024
_LANE = 128


def _round_up(x, m):
    return ((x + m - 1) // m) * m


def _cp(c):
    """Stored channel count: padded to a multiple of 128 (lane-dense)."""
    return max(_LANE, _round_up(c, _LANE))


# ----------------------------------------------------------------------------
# Pallas kernel 1: fused-im2col conv GEMM.
#   x0 = flat activation rows [i*tm, (i+1)*tm),  x1 = rows [(i+1)*tm, (i+2)*tm)
#   out rows q = sum_t x_flat[q + off_t, :] @ W[t]   (tap loop unrolled in-kernel)
# ----------------------------------------------------------------------------
def _conv_tap_kernel(x0_ref, x1_ref, w_ref, o_ref, *, offsets, tm, activation):
    cinp = x0_ref.shape[1]
    coutp = w_ref.shape[2]
    xx = jnp.concatenate([x0_ref[...], x1_ref[...]], axis=0)      # (2*tm, cinp) bf16
    acc = jnp.zeros((tm, coutp), jnp.float32)
    for t, off in enumerate(offsets):                             # static unroll over taps
        xt = jax.lax.slice(xx, (off, 0), (off + tm, cinp))
        acc = acc + jnp.dot(xt, w_ref[t], preferred_element_type=jnp.float32)
    if activation == "tanh":
        acc = jnp.tanh(acc)
    o_ref[...] = acc.astype(o_ref.dtype)


def _conv_gemm(xp, w_taps, kh, kw, *, activation=None, out_dtype=jnp.bfloat16):
    """Valid stride-1 (kh x kw) conv on a pre-padded NHWC bf16 input.

    xp:      (N, Hp, Wp, Cp)  bf16, Cp a multiple of 128.
    w_taps:  (kh*kw, Cp, Coutp) bf16, whole weight kept resident in VMEM.
    Returns  (N, Hp-kh+1, Wp-kw+1, Coutp) in out_dtype.
    """
    N, Hp, Wp, Cp = xp.shape
    ntaps, cinp, coutp = w_taps.shape
    assert ntaps == kh * kw and cinp == Cp, (w_taps.shape, xp.shape, kh, kw)

    offsets = tuple(r * Wp + c for r in range(kh) for c in range(kw))
    max_off = offsets[-1]
    tm = max(512, _round_up(max_off, 16))          # halo must fit inside one extra block

    Q = N * Hp * Wp
    Mp = _round_up(Q, tm)
    n_m = Mp // tm
    x_flat = xp.reshape(Q, Cp)
    x_flat = jnp.pad(x_flat, ((0, Mp + tm - Q), (0, 0)))   # extra zero block for the halo

    kernel = functools.partial(_conv_tap_kernel, offsets=offsets, tm=tm,
                               activation=activation)
    out = pl.pallas_call(
        kernel,
        out_shape=jax.ShapeDtypeStruct((Mp, coutp), out_dtype),
        grid_spec=pltpu.PrefetchScalarGridSpec(
            num_scalar_prefetch=0,
            grid=(n_m,),
            in_specs=[
                pl.BlockSpec((tm, Cp), lambda i: (i, 0)),
                pl.BlockSpec((tm, Cp), lambda i: (i + 1, 0)),
                pl.BlockSpec((ntaps, cinp, coutp), lambda i: (0, 0, 0)),  # resident weight
            ],
            out_specs=pl.BlockSpec((tm, coutp), lambda i: (i, 0)),
        ),
        compiler_params=pltpu.CompilerParams(
            dimension_semantics=("parallel",),
            vmem_limit_bytes=_VMEM_LIMIT_BYTES,
        ),
    )(x_flat, x_flat, w_taps)

    Ho, Wo = Hp - kh + 1, Wp - kw + 1
    out = out[:Q].reshape(N, Hp, Wp, coutp)
    return out[:, :Ho, :Wo, :]


# ----------------------------------------------------------------------------
# Conv wrappers (glue is pure reshapes / pads in bf16)
# ----------------------------------------------------------------------------
def conv2d(x, w_taps, *, k, padding, activation=None, out_dtype=jnp.bfloat16):
    """Conv2d(k, stride=1, padding, bias=False) on channel-padded NHWC bf16 input."""
    xp = jnp.pad(x, ((0, 0), (padding, padding), (padding, padding), (0, 0)))
    return _conv_gemm(xp, w_taps, k, k, activation=activation, out_dtype=out_dtype)


def conv2d_down(x, w_taps):
    """Conv2d(4, stride=2, padding=1, bias=False) via space-to-depth + stride-1 2x2 conv."""
    N, H, W, Cp = x.shape
    assert H % 2 == 0 and W % 2 == 0
    xp = jnp.pad(x, ((0, 0), (1, 1), (1, 1), (0, 0)))
    Hp, Wp = H + 2, W + 2
    xs = xp.reshape(N, Hp // 2, 2, Wp // 2, 2, Cp)
    xs = jnp.transpose(xs, (0, 1, 3, 2, 4, 5)).reshape(N, Hp // 2, Wp // 2, 4 * Cp)
    return _conv_gemm(xs, w_taps, 2, 2)


def conv_transpose_up(x, w_taps, cpad_out):
    """ConvTranspose2d(4, stride=2, padding=1, bias=False) via output-parity decomposition:
    one stride-1 2x2 conv producing 4*cpad_out channels, then interleave to 2x spatial."""
    N, H, W, Cp = x.shape
    xp = jnp.pad(x, ((0, 0), (1, 1), (1, 1), (0, 0)))
    y = _conv_gemm(xp, w_taps, 2, 2)                        # (N, H+1, W+1, 4*cpad_out)
    y6 = y.reshape(N, H + 1, W + 1, 2, 2, cpad_out)
    rows = []
    for a in (0, 1):
        cols = [y6[:, a:a + H, b:b + W, a, b, :] for b in (0, 1)]
        rows.append(jnp.stack(cols, axis=3))                # (N, H, W, 2, cpad_out)
    z = jnp.stack(rows, axis=2)                             # (N, H, 2, W, 2, cpad_out)
    return z.reshape(N, 2 * H, 2 * W, cpad_out)


# ----------------------------------------------------------------------------
# Pallas kernels 2+3: InstanceNorm2d(affine) (+ ReLU) (+ residual), HW-tiled two-pass
# ----------------------------------------------------------------------------
def _in_stats_kernel(x_ref, sum_ref, sq_ref):
    @pl.when(pl.program_id(1) == 0)
    def _init():
        sum_ref[...] = jnp.zeros_like(sum_ref)
        sq_ref[...] = jnp.zeros_like(sq_ref)

    x = x_ref[...].astype(jnp.float32)                      # (1, thw, C)
    sum_ref[...] += jnp.sum(x, axis=1, keepdims=True)
    sq_ref[...] += jnp.sum(x * x, axis=1, keepdims=True)


def _in_apply_kernel(x_ref, sum_ref, sq_ref, gamma_ref, beta_ref, *rest,
                     inv_count, eps, relu, has_res):
    if has_res:
        res_ref, o_ref = rest
    else:
        (o_ref,) = rest
    x = x_ref[...].astype(jnp.float32)
    mean = sum_ref[...] * inv_count
    var = jnp.maximum(sq_ref[...] * inv_count - mean * mean, 0.0)
    y = (x - mean) * (gamma_ref[...] * jax.lax.rsqrt(var + eps)) + beta_ref[...]
    if relu:
        y = jnp.maximum(y, 0.0)
    if has_res:
        y = y + res_ref[...].astype(jnp.float32)
    o_ref[...] = y.astype(o_ref.dtype)


def _pick_hw_tile(hw, c):
    limit = max(8, (2 * 1024 * 1024) // max(1, 2 * c))      # ~2 MiB bf16 per x block
    thw = hw
    while thw > limit and thw % 2 == 0 and (thw // 2) % 8 == 0:
        thw //= 2
    return thw


def instance_norm(x, gamma, beta, *, relu=False, residual=None, eps=1e-5):
    """NHWC instance norm with affine params, optional fused ReLU / residual add."""
    N, H, W, C = x.shape
    HW = H * W
    x2 = x.reshape(N, HW, C)
    thw = _pick_hw_tile(HW, C)
    n_hw = HW // thw

    stats_sum, stats_sq = pl.pallas_call(
        _in_stats_kernel,
        out_shape=(jax.ShapeDtypeStruct((N, 1, C), jnp.float32),
                   jax.ShapeDtypeStruct((N, 1, C), jnp.float32)),
        grid_spec=pltpu.PrefetchScalarGridSpec(
            num_scalar_prefetch=0,
            grid=(N, n_hw),
            in_specs=[pl.BlockSpec((1, thw, C), lambda n, t: (n, t, 0))],
            out_specs=(pl.BlockSpec((1, 1, C), lambda n, t: (n, 0, 0)),
                       pl.BlockSpec((1, 1, C), lambda n, t: (n, 0, 0))),
        ),
        compiler_params=pltpu.CompilerParams(
            dimension_semantics=("parallel", "arbitrary"),
            vmem_limit_bytes=_VMEM_LIMIT_BYTES,
        ),
    )(x2)

    args = [x2, stats_sum, stats_sq, gamma, beta]
    in_specs = [
        pl.BlockSpec((1, thw, C), lambda n, t: (n, t, 0)),
        pl.BlockSpec((1, 1, C), lambda n, t: (n, 0, 0)),
        pl.BlockSpec((1, 1, C), lambda n, t: (n, 0, 0)),
        pl.BlockSpec((1, 1, C), lambda n, t: (0, 0, 0)),
        pl.BlockSpec((1, 1, C), lambda n, t: (0, 0, 0)),
    ]
    has_res = residual is not None
    if has_res:
        args.append(residual.reshape(N, HW, C))
        in_specs.append(pl.BlockSpec((1, thw, C), lambda n, t: (n, t, 0)))

    kernel = functools.partial(_in_apply_kernel, inv_count=1.0 / HW, eps=eps,
                               relu=relu, has_res=has_res)
    out = pl.pallas_call(
        kernel,
        out_shape=jax.ShapeDtypeStruct((N, HW, C), x.dtype),
        grid_spec=pltpu.PrefetchScalarGridSpec(
            num_scalar_prefetch=0,
            grid=(N, n_hw),
            in_specs=in_specs,
            out_specs=pl.BlockSpec((1, thw, C), lambda n, t: (n, t, 0)),
        ),
        compiler_params=pltpu.CompilerParams(
            dimension_semantics=("parallel", "parallel"),
            vmem_limit_bytes=_VMEM_LIMIT_BYTES,
        ),
    )(*args)
    return out.reshape(N, H, W, C)


# ----------------------------------------------------------------------------
# Weight packing (hoisted to parameter init): PyTorch layouts -> (taps, Cin_pad, Cout_pad) bf16
# ----------------------------------------------------------------------------
def _hwio_embed(w_oihw, cin_store, placements):
    """OIHW conv weight -> HWIO with input channels scattered into the stored (padded) layout.

    placements: list of (dst_offset, src_offset, length) along the input-channel axis."""
    cout, cin, kh, kw = w_oihw.shape
    w = jnp.transpose(w_oihw, (2, 3, 1, 0))                 # (kh, kw, cin, cout)
    out = jnp.zeros((kh, kw, cin_store, cout), w.dtype)
    for dst, src, ln in placements:
        out = out.at[:, :, dst:dst + ln, :].set(w[:, :, src:src + ln, :])
    return out


def _pack_taps(w_hwio, coutp):
    kh, kw, cin, cout = w_hwio.shape
    w = jnp.pad(w_hwio, ((0, 0), (0, 0), (0, 0), (0, coutp - cout)))
    return w.reshape(kh * kw, cin, coutp).astype(jnp.bfloat16)


def _pack_s2d_taps(w_hwio, coutp):
    """4x4 stride-2 conv weight -> taps of the equivalent stride-1 2x2 conv on s2d input."""
    kh, kw, cin, cout = w_hwio.shape
    assert kh == 4 and kw == 4
    w = jnp.pad(w_hwio, ((0, 0), (0, 0), (0, 0), (0, coutp - cout)))
    w6 = w.reshape(2, 2, 2, 2, cin, coutp)                  # (p, a, q, b, c, co)
    w6 = jnp.transpose(w6, (0, 2, 1, 3, 4, 5))              # (p, q, a, b, c, co)
    return w6.reshape(4, 4 * cin, coutp).astype(jnp.bfloat16)


def _pack_convt_taps(w_torch, cin_store, cin_real, cpad_out):
    """ConvTranspose2d(4,2,1) weight (Cin, Cout, 4, 4) -> taps of the parity-decomposed
    stride-1 2x2 conv with 4*cpad_out output channels (column layout (a, b, co))."""
    cin, cout, kh, kw = w_torch.shape
    assert kh == 4 and kw == 4 and cin == cin_real
    wf = jnp.transpose(w_torch[:, :, ::-1, ::-1], (2, 3, 0, 1))   # flipped -> (kh, kw, ci, co)
    wf = jnp.pad(wf, ((0, 0), (0, 0), (0, cin_store - cin), (0, cpad_out - cout)))
    w6 = wf.reshape(2, 2, 2, 2, cin_store, cpad_out)        # (u, a, v, b, ci, co)
    w6 = jnp.transpose(w6, (0, 2, 4, 1, 3, 5))              # (u, v, ci, a, b, co)
    return w6.reshape(4, cin_store, 4 * cpad_out).astype(jnp.bfloat16)


# ----------------------------------------------------------------------------
# Parameter setup (deterministic, PyTorch-default-like init)
# ----------------------------------------------------------------------------
def init_generator_params(key, conv_dim=64, repeat_num=6, input_nc=3):
    cd = conv_dim
    c_img_store = _cp(input_nc)
    c1_store = _cp(cd)
    c2_store = _cp(2 * cd)
    c_cat_store = 2 * c2_store
    c_main_store = _cp(4 * cd)

    keys = iter(jax.random.split(key, 16 + 2 * repeat_num))

    def uconv(cout, cin, k):
        fan_in = cin * k * k
        b = 1.0 / (fan_in ** 0.5)
        return jax.random.uniform(next(keys), (cout, cin, k, k), jnp.float32, -b, b)

    def uconvt(cin, cout, k):
        fan_in = cout * k * k   # PyTorch fan-in convention for ConvTranspose2d weights
        b = 1.0 / (fan_in ** 0.5)
        return jax.random.uniform(next(keys), (cin, cout, k, k), jnp.float32, -b, b)

    def in_p(c_store):
        # InstanceNorm2d(affine=True) defaults: weight=1, bias=0 (pad is consistent with zeros)
        return (jnp.ones((1, 1, c_store), jnp.float32),
                jnp.zeros((1, 1, c_store), jnp.float32))

    def branch():
        w1 = uconv(cd, input_nc, 7)
        c1 = _pack_taps(_hwio_embed(w1, c_img_store, [(0, 0, input_nc)]), c1_store)
        g1, b1 = in_p(c1_store)
        w2 = uconv(2 * cd, cd, 4)
        c2 = _pack_s2d_taps(_hwio_embed(w2, c1_store, [(0, 0, cd)]), c2_store)
        g2, b2 = in_p(c2_store)
        return {"c1": c1, "in1_g": g1, "in1_b": b1,
                "c2": c2, "in2_g": g2, "in2_b": b2}

    params = {"branch1": branch(), "branch2": branch()}

    wmd = uconv(4 * cd, 4 * cd, 4)
    params["main_down"] = _pack_s2d_taps(
        _hwio_embed(wmd, c_cat_store, [(0, 0, 2 * cd), (c2_store, 2 * cd, 2 * cd)]),
        c_main_store)

    # TODO(synk): SimpleResidualBlock's definition is not included in the spec; using the
    # standard residual block from this repo family (conv3x3-IN-ReLU-conv3x3-IN + skip).
    res = []
    for _ in range(repeat_num):
        wa = uconv(4 * cd, 4 * cd, 3)
        wb = uconv(4 * cd, 4 * cd, 3)
        ga, ba = in_p(c_main_store)
        gb, bb = in_p(c_main_store)
        res.append({
            "c1": _pack_taps(_hwio_embed(wa, c_main_store, [(0, 0, 4 * cd)]), c_main_store),
            "in1_g": ga, "in1_b": ba,
            "c2": _pack_taps(_hwio_embed(wb, c_main_store, [(0, 0, 4 * cd)]), c_main_store),
            "in2_g": gb, "in2_b": bb})
    params["res"] = res

    ups = []
    curr_real, curr_store = 4 * cd, c_main_store
    for _ in range(2):
        g, b = in_p(curr_store)
        wt = uconvt(curr_real, curr_real // 2, 4)
        cpo = _cp(curr_real // 2)
        ups.append({"in_g": g, "in_b": b,
                    "ct": _pack_convt_taps(wt, curr_store, curr_real, cpo),
                    "cpad_out": cpo})
        curr_real //= 2
        curr_store = cpo
    params["up"] = ups

    ob = {"in_g": [], "in_b": [], "c": []}
    for _ in range(2):
        g, b = in_p(curr_store)
        ob["in_g"].append(g)
        ob["in_b"].append(b)
        w = uconv(curr_real, curr_real, 3)
        ob["c"].append(_pack_taps(_hwio_embed(w, curr_store, [(0, 0, curr_real)]), curr_store))
    g, b = in_p(curr_store)
    ob["in_g"].append(g)
    ob["in_b"].append(b)
    wfin = uconv(3, curr_real, 7)
    ob["c_final"] = _pack_taps(_hwio_embed(wfin, curr_store, [(0, 0, curr_real)]), _LANE)
    params["out"] = ob
    return params


# ----------------------------------------------------------------------------
# Forward (matches GeneratorReferenceMakeup.forward)
# ----------------------------------------------------------------------------
def generator_forward(x_nchw, y_nchw, params):
    def prep(img):  # NCHW f32 -> NHWC bf16, channel-padded to 128
        t = jnp.transpose(img, (0, 2, 3, 1)).astype(jnp.bfloat16)
        c = t.shape[-1]
        return jnp.pad(t, ((0, 0), (0, 0), (0, 0), (0, _cp(c) - c)))

    def branch(h, p):
        h = conv2d(h, p["c1"], k=7, padding=3)
        h = instance_norm(h, p["in1_g"], p["in1_b"], relu=True)
        h = conv2d_down(h, p["c2"])
        h = instance_norm(h, p["in2_g"], p["in2_b"], relu=True)
        return h

    hx = branch(prep(x_nchw), params["branch1"])
    hy = branch(prep(y_nchw), params["branch2"])
    h = jnp.concatenate([hx, hy], axis=-1)          # torch.cat(dim=1) in NHWC

    h = conv2d_down(h, params["main_down"])
    for rb in params["res"]:
        r = conv2d(h, rb["c1"], k=3, padding=1)
        r = instance_norm(r, rb["in1_g"], rb["in1_b"], relu=True)
        r = conv2d(r, rb["c2"], k=3, padding=1)
        h = instance_norm(r, rb["in2_g"], rb["in2_b"], relu=False, residual=h)
    for up in params["up"]:
        h = instance_norm(h, up["in_g"], up["in_b"], relu=True)
        h = conv_transpose_up(h, up["ct"], up["cpad_out"])

    ob = params["out"]
    for i in range(2):
        h = instance_norm(h, ob["in_g"][i], ob["in_b"][i], relu=True)
        h = conv2d(h, ob["c"][i], k=3, padding=1)
    h = instance_norm(h, ob["in_g"][2], ob["in_b"][2], relu=True)
    h = conv2d(h, ob["c_final"], k=7, padding=3, activation="tanh",
               out_dtype=jnp.float32)
    h = h[..., :3]
    return jnp.transpose(h, (0, 3, 1, 2))


# ----------------------------------------------------------------------------
# Self-checks of the conv / IN primitives against XLA references (bf16-matched operands)
# ----------------------------------------------------------------------------
def _self_check():
    key = jax.random.PRNGKey(42)
    ks = jax.random.split(key, 8)

    def ref_conv(x, w_hwio, stride, pad, lhs_dilation=(1, 1)):
        return jax.lax.conv_general_dilated(
            x.astype(jnp.float32),
            w_hwio.astype(jnp.bfloat16).astype(jnp.float32),
            window_strides=(stride, stride),
            padding=[(pad, pad), (pad, pad)],
            lhs_dilation=lhs_dilation,
            dimension_numbers=("NHWC", "HWIO", "NHWC"))

    # 1) stride-1 3x3 conv
    cin, cout = 5, 7
    x = jax.random.normal(ks[0], (1, 10, 12, cin), jnp.float32).astype(jnp.bfloat16)
    w = jax.random.normal(ks[1], (cout, cin, 3, 3), jnp.float32) * 0.2
    xs = jnp.pad(x, ((0, 0), (0, 0), (0, 0), (0, _cp(cin) - cin)))
    wt = _pack_taps(_hwio_embed(w, _cp(cin), [(0, 0, cin)]), _cp(cout))
    got = conv2d(xs, wt, k=3, padding=1, out_dtype=jnp.float32)[..., :cout]
    ref = ref_conv(x, jnp.transpose(w, (2, 3, 1, 0)), 1, 1)
    assert float(jnp.max(jnp.abs(got - ref))) < 5e-2, "conv2d self-check failed"

    # 2) stride-2 4x4 conv via space-to-depth
    cin, cout = 6, 5
    x = jax.random.normal(ks[2], (1, 8, 8, cin), jnp.float32).astype(jnp.bfloat16)
    w = jax.random.normal(ks[3], (cout, cin, 4, 4), jnp.float32) * 0.2
    xs = jnp.pad(x, ((0, 0), (0, 0), (0, 0), (0, _cp(cin) - cin)))
    wt = _pack_s2d_taps(_hwio_embed(w, _cp(cin), [(0, 0, cin)]), _cp(cout))
    got = conv2d_down(xs, wt)[..., :cout].astype(jnp.float32)
    ref = ref_conv(x, jnp.transpose(w, (2, 3, 1, 0)), 2, 1)
    assert float(jnp.max(jnp.abs(got - ref))) < 5e-2, "conv2d_down self-check failed"

    # 3) ConvTranspose2d(4,2,1) via output-parity decomposition
    cin, cout = 6, 5
    x = jax.random.normal(ks[4], (1, 7, 9, cin), jnp.float32).astype(jnp.bfloat16)
    wt_t = jax.random.normal(ks[5], (cin, cout, 4, 4), jnp.float32) * 0.2
    xs = jnp.pad(x, ((0, 0), (0, 0), (0, 0), (0, _cp(cin) - cin)))
    packed = _pack_convt_taps(wt_t, _cp(cin), cin, _cp(cout))
    got = conv_transpose_up(xs, packed, _cp(cout))[..., :cout].astype(jnp.float32)
    wf = jnp.transpose(wt_t[:, :, ::-1, ::-1], (2, 3, 0, 1))
    ref = ref_conv(x, wf, 1, 2, lhs_dilation=(2, 2))
    assert got.shape == ref.shape, (got.shape, ref.shape)
    assert float(jnp.max(jnp.abs(got - ref))) < 5e-2, "conv_transpose self-check failed"

    # 4) instance norm + relu
    x = jax.random.normal(ks[6], (2, 6, 6, 128), jnp.float32).astype(jnp.bfloat16)
    gamma = 1.0 + 0.1 * jax.random.normal(ks[7], (1, 1, 128), jnp.float32)
    beta = 0.1 * jnp.ones((1, 1, 128), jnp.float32)
    got = instance_norm(x, gamma, beta, relu=True).astype(jnp.float32)
    xf = x.astype(jnp.float32)
    mean = jnp.mean(xf, axis=(1, 2), keepdims=True)
    var = jnp.mean((xf - mean) ** 2, axis=(1, 2), keepdims=True)
    ref = jnp.maximum((xf - mean) * jax.lax.rsqrt(var + 1e-5) * gamma + beta, 0.0)
    assert float(jnp.max(jnp.abs(got - ref))) < 5e-2, "instance_norm self-check failed"


if __name__ == "__main__":
    _self_check()

    key = jax.random.PRNGKey(0)
    kx, ky, kp = jax.random.split(key, 3)

    # Small but architecture-consistent shapes: batch=2, 3 channels, 16x16 images,
    # conv_dim=8, repeat_num=2  =>  output is (2, 3, 16, 16).
    N, C, H, W = 2, 3, 16, 16
    x = jax.random.normal(kx, (N, C, H, W), jnp.float32)
    y = jax.random.normal(ky, (N, C, H, W), jnp.float32)
    params = init_generator_params(kp, conv_dim=8, repeat_num=2, input_nc=3)

    fwd = jax.jit(lambda a, b: generator_forward(a, b, params))
    out = fwd(x, y)
    jax.block_until_ready(out)

    assert out.shape == (N, 3, H, W), f"unexpected output shape {out.shape}"
    assert out.dtype == jnp.float32
    assert bool(jnp.all(jnp.isfinite(out)))
    assert bool(jnp.all(jnp.abs(out) <= 1.0 + 1e-5))   # tanh range
    print("KERNEL_OK")
</pallas_src>

<mosaic_0001>
module attributes {stable_mosaic.version = 11 : i64} {
  func.func @_conv_tap_kernel(%arg0: i32, %arg1: memref<512x128xbf16, #tpu.memory_space<vmem>>, %arg2: memref<512x128xbf16, #tpu.memory_space<vmem>>, %arg3: memref<9x128x128xbf16, #tpu.memory_space<vmem>>, %arg4: memref<512x128xf32, #tpu.memory_space<vmem>>) attributes {dimension_semantics = [#tpu.dimension_semantics<parallel>], iteration_bounds = array<i64: 1>, scalar_prefetch = 0 : i64, scratch_operands = 0 : i64, tpu.core_type = #tpu.core_type<tc>, window_params = [{transform_indices = @transform_0, window_bounds = array<i64: 512, 128>}, {transform_indices = @transform_1, window_bounds = array<i64: 512, 128>}, {pipeline_mode = #tpu.pipeline_mode<synchronous>, transform_indices = @transform_2, window_bounds = array<i64: 9, 128, 128>}, {transform_indices = @transform_3, window_bounds = array<i64: 512, 128>}]} {
    %c0 = arith.constant 0 : index
    %c0_0 = arith.constant 0 : index
    %0 = vector.load %arg1[%c0, %c0_0] : memref<512x128xbf16, #tpu.memory_space<vmem>>, vector<512x128xbf16>
    %c0_1 = arith.constant 0 : index
    %c0_2 = arith.constant 0 : index
    %1 = vector.load %arg2[%c0_1, %c0_2] : memref<512x128xbf16, #tpu.memory_space<vmem>>, vector<512x128xbf16>
    %2 = tpu.concatenate %0, %1 in 0 : vector<512x128xbf16>, vector<512x128xbf16> -> vector<1024x128xbf16>
    %cst = arith.constant 0.000000e+00 : f32
    %3 = vector.broadcast %cst : f32 to vector<512x128xf32>
    %4 = vector.extract_strided_slice %2 {offsets = [0, 0], sizes = [512, 128], strides = [1, 1]} : vector<1024x128xbf16> to vector<512x128xbf16>
    %c0_3 = arith.constant 0 : index
    %c0_4 = arith.constant 0 : index
    %c0_5 = arith.constant 0 : index
    %5 = vector.load %arg3[%c0_3, %c0_4, %c0_5] : memref<9x128x128xbf16, #tpu.memory_space<vmem>>, vector<1x128x128xbf16>
    %6 = vector.shape_cast %5 : vector<1x128x128xbf16> to vector<128x128xbf16>
    %cst_6 = arith.constant dense<0.000000e+00> : vector<512x128xf32>
    %7 = tpu.matmul %4, %6, %cst_6 {dimension_numbers = #tpu.dot_dimension_numbers<[1], [0], [0], [1], [0, 0, 1, 1], [], []>} : vector<512x128xbf16>, vector<128x128xbf16>, vector<512x128xf32> -> vector<512x128xf32>
    %8 = arith.addf %3, %7 : vector<512x128xf32>
    %9 = vector.extract_strided_slice %2 {offsets = [1, 0], sizes = [512, 128], strides = [1, 1]} : vector<1024x128xbf16> to vector<512x128xbf16>
    %c1 = arith.constant 1 : index
    %c0_7 = arith.constant 0 : index
    %c0_8 = arith.constant 0 : index
    %10 = vector.load %arg3[%c1, %c0_7, %c0_8] : memref<9x128x128xbf16, #tpu.memory_space<vmem>>, vector<1x128x128xbf16>
    %11 = vector.shape_cast %10 : vector<1x128x128xbf16> to vector<128x128xbf16>
    %cst_9 = arith.constant dense<0.000000e+00> : vector<512x128xf32>
    %12 = tpu.matmul %9, %11, %cst_9 {dimension_numbers = #tpu.dot_dimension_numbers<[1], [0], [0], [1], [0, 0, 1, 1], [], []>} : vector<512x128xbf16>, vector<128x128xbf16>, vector<512x128xf32> -> vector<512x128xf32>
    %13 = arith.addf %8, %12 : vector<512x128xf32>
    %14 = vector.extract_strided_slice %2 {offsets = [2, 0], sizes = [512, 128], strides = [1, 1]} : vector<1024x128xbf16> to vector<512x128xbf16>
    %c2 = arith.constant 2 : index
    %c0_10 = arith.constant 0 : index
    %c0_11 = arith.constant 0 : index
    %15 = vector.load %arg3[%c2, %c0_10, %c0_11] : memref<9x128x128xbf16, #tpu.memory_space<vmem>>, vector<1x128x128xbf16>
    %16 = vector.shape_cast %15 : vector<1x128x128xbf16> to vector<128x128xbf16>
    %cst_12 = arith.constant dense<0.000000e+00> : vector<512x128xf32>
    %17 = tpu.matmul %14, %16, %cst_12 {dimension_numbers = #tpu.dot_dimension_numbers<[1], [0], [0], [1], [0, 0, 1, 1], [], []>} : vector<512x128xbf16>, vector<128x128xbf16>, vector<512x128xf32> -> vector<512x128xf32>
    %18 = arith.addf %13, %17 : vector<512x128xf32>
    %19 = vector.extract_strided_slice %2 {offsets = [14, 0], sizes = [512, 128], strides = [1, 1]} : vector<1024x128xbf16> to vector<512x128xbf16>
    %c3 = arith.constant 3 : index
    %c0_13 = arith.constant 0 : index
    %c0_14 = arith.constant 0 : index
    %20 = vector.load %arg3[%c3, %c0_13, %c0_14] : memref<9x128x128xbf16, #tpu.memory_space<vmem>>, vector<1x128x128xbf16>
    %21 = vector.shape_cast %20 : vector<1x128x128xbf16> to vector<128x128xbf16>
    %cst_15 = arith.constant dense<0.000000e+00> : vector<512x128xf32>
    %22 = tpu.matmul %19, %21, %cst_15 {dimension_numbers = #tpu.dot_dimension_numbers<[1], [0], [0], [1], [0, 0, 1, 1], [], []>} : vector<512x128xbf16>, vector<128x128xbf16>, vector<512x128xf32> -> vector<512x128xf32>
    %23 = arith.addf %18, %22 : vector<512x128xf32>
    %24 = vector.extract_strided_slice %2 {offsets = [15, 0], sizes = [512, 128], strides = [1, 1]} : vector<1024x128xbf16> to vector<512x128xbf16>
    %c4 = arith.constant 4 : index
    %c0_16 = arith.constant 0 : index
    %c0_17 = arith.constant 0 : index
    %25 = vector.load %arg3[%c4, %c0_16, %c0_17] : memref<9x128x128xbf16, #tpu.memory_space<vmem>>, vector<1x128x128xbf16>
    %26 = vector.shape_cast %25 : vector<1x128x128xbf16> to vector<128x128xbf16>
    %cst_18 = arith.constant dense<0.000000e+00> : vector<512x128xf32>
    %27 = tpu.matmul %24, %26, %cst_18 {dimension_numbers = #tpu.dot_dimension_numbers<[1], [0], [0], [1], [0, 0, 1, 1], [], []>} : vector<512x128xbf16>, vector<128x128xbf16>, vector<512x128xf32> -> vector<512x128xf32>
    %28 = arith.addf %23, %27 : vector<512x128xf32>
    %29 = vector.extract_strided_slice %2 {offsets = [16, 0], sizes = [512, 128], strides = [1, 1]} : vector<1024x128xbf16> to vector<512x128xbf16>
    %c5 = arith.constant 5 : index
    %c0_19 = arith.constant 0 : index
    %c0_20 = arith.constant 0 : index
    %30 = vector.load %arg3[%c5, %c0_19, %c0_20] : memref<9x128x128xbf16, #tpu.memory_space<vmem>>, vector<1x128x128xbf16>
    %31 = vector.shape_cast %30 : vector<1x128x128xbf16> to vector<128x128xbf16>
    %cst_21 = arith.constant dense<0.000000e+00> : vector<512x128xf32>
    %32 = tpu.matmul %29, %31, %cst_21 {dimension_numbers = #tpu.dot_dimension_numbers<[1], [0], [0], [1], [0, 0, 1, 1], [], []>} : vector<512x128xbf16>, vector<128x128xbf16>, vector<512x128xf32> -> vector<512x128xf32>
    %33 = arith.addf %28, %32 : vector<512x128xf32>
    %34 = vector.extract_strided_slice %2 {offsets = [28, 0], sizes = [512, 128], strides = [1, 1]} : vector<1024x128xbf16> to vector<512x128xbf16>
    %c6 = arith.constant 6 : index
    %c0_22 = arith.constant 0 : index
    %c0_23 = arith.constant 0 : index
    %35 = vector.load %arg3[%c6, %c0_22, %c0_23] : memref<9x128x128xbf16, #tpu.memory_space<vmem>>, vector<1x128x128xbf16>
    %36 = vector.shape_cast %35 : vector<1x128x128xbf16> to vector<128x128xbf16>
    %cst_24 = arith.constant dense<0.000000e+00> : vector<512x128xf32>
    %37 = tpu.matmul %34, %36, %cst_24 {dimension_numbers = #tpu.dot_dimension_numbers<[1], [0], [0], [1], [0, 0, 1, 1], [], []>} : vector<512x128xbf16>, vector<128x128xbf16>, vector<512x128xf32> -> vector<512x128xf32>
    %38 = arith.addf %33, %37 : vector<512x128xf32>
    %39 = vector.extract_strided_slice %2 {offsets = [29, 0], sizes = [512, 128], strides = [1, 1]} : vector<1024x128xbf16> to vector<512x128xbf16>
    %c7 = arith.constant 7 : index
    %c0_25 = arith.constant 0 : index
    %c0_26 = arith.constant 0 : index
    %40 = vector.load %arg3[%c7, %c0_25, %c0_26] : memref<9x128x128xbf16, #tpu.memory_space<vmem>>, vector<1x128x128xbf16>
    %41 = vector.shape_cast %40 : vector<1x128x128xbf16> to vector<128x128xbf16>
    %cst_27 = arith.constant dense<0.000000e+00> : vector<512x128xf32>
    %42 = tpu.matmul %39, %41, %cst_27 {dimension_numbers = #tpu.dot_dimension_numbers<[1], [0], [0], [1], [0, 0, 1, 1], [], []>} : vector<512x128xbf16>, vector<128x128xbf16>, vector<512x128xf32> -> vector<512x128xf32>
    %43 = arith.addf %38, %42 : vector<512x128xf32>
    %44 = vector.extract_strided_slice %2 {offsets = [30, 0], sizes = [512, 128], strides = [1, 1]} : vector<1024x128xbf16> to vector<512x128xbf16>
    %c8 = arith.constant 8 : index
    %c0_28 = arith.constant 0 : index
    %c0_29 = arith.constant 0 : index
    %45 = vector.load %arg3[%c8, %c0_28, %c0_29] : memref<9x128x128xbf16, #tpu.memory_space<vmem>>, vector<1x128x128xbf16>
    %46 = vector.shape_cast %45 : vector<1x128x128xbf16> to vector<128x128xbf16>
    %cst_30 = arith.constant dense<0.000000e+00> : vector<512x128xf32>
    %47 = tpu.matmul %44, %46, %cst_30 {dimension_numbers = #tpu.dot_dimension_numbers<[1], [0], [0], [1], [0, 0, 1, 1], [], []>} : vector<512x128xbf16>, vector<128x128xbf16>, vector<512x128xf32> -> vector<512x128xf32>
    %48 = arith.addf %43, %47 : vector<512x128xf32>
    %c0_31 = arith.constant 0 : index
    %c0_32 = arith.constant 0 : index
    %49 = vector.load %arg4[%c0_31, %c0_32] : memref<512x128xf32, #tpu.memory_space<vmem>>, vector<512x128xf32>
    tpu.vector_store %arg4[%c0_31, %c0_32], %48 {strides = array<i32>} : memref<512x128xf32, #tpu.memory_space<vmem>>, vector<512x128xf32>,
    return
  }
  func.func @transform_0(%arg0: i32) -> (i32, i32) {
    %c0_i32 = arith.constant 0 : i32
    %c0_i32_0 = arith.constant 0 : i32
    return %arg0, %c0_i32 : i32, i32
  }
  func.func @transform_1(%arg0: i32) -> (i32, i32) {
    %c1_i32 = arith.constant 1 : i32
    %0 = arith.addi %arg0, %c1_i32 : i32
    %c0_i32 = arith.constant 0 : i32
    %c0_i32_0 = arith.constant 0 : i32
    return %0, %c0_i32 : i32, i32
  }
  func.func @transform_2(%arg0: i32) -> (i32, i32, i32) {
    %c0_i32 = arith.constant 0 : i32
    %c0_i32_0 = arith.constant 0 : i32
    %c0_i32_1 = arith.constant 0 : i32
    %c0_i32_2 = arith.constant 0 : i32
    return %c0_i32, %c0_i32_0, %c0_i32_1 : i32, i32, i32
  }
  func.func @transform_3(%arg0: i32) -> (i32, i32) {
    %c0_i32 = arith.constant 0 : i32
    %c0_i32_0 = arith.constant 0 : i32
    return %arg0, %c0_i32 : i32, i32
  }
}

</mosaic_0001>

<bundles_post_ra>
// kernel: tpu_custom_call.1
= control target key start
LH: loop header
LB: loop body
LE: loop exit
PB: predicated region body
PF: predicated region fallthrough
CT: control target
= control target key end

     0   :  { %8 = vsyncpa [#allocation3], 0  ;;  %s8034_s0 = inlined_call_operand.hbm [shape: bf16[1024,128], index: 0, kind: input, shape index: {}]   ;;  %s8035_s1 = inlined_call_operand.hbm [shape: bf16[1024,128], index: 1, kind: input, shape index: {}]   ;;  %s8036_s2 = inlined_call_operand.hbm [shape: bf16[9,128,128], index: 2, kind: input, shape index: {}]   ;;  %s8037_s3 = inlined_call_operand.hbm [shape: f32[512,128], index: 3, kind: output, shape index: {}]  }
   0x1   :  { %9 = vsyncpa [#allocation6], 0 }
   0x2   :  { %10 = vsyncpa [#allocation4], 0  ;;  %s4940_s14 = scalar_lea.hbm %s8035_s1, 4096  ;;  %s6907_s15 = smov [#allocation5]  }
   0x3   :  { %s32_s16 = sshll.u32 %s6907_s15, 4  ;;  %s6908_s17 = smov [#allocation2]   ;;  %s33_s16 = int_to_ptr.vmem [resolvable:$true] %s32_s16 }
   0x4   :  { %s16_s18 = sshll.u32 %s6908_s17, 4  ;;  %s6834_s21 = scalar_lea.hbm %s8035_s1, 8192  ;;  %s17_s18 = int_to_ptr.vmem [resolvable:$true] %s16_s18 }
   0x5   :  { %p6811_p0 = scmp.ne.s32.totalorder %s4940_s14, %s6834_s21  ;;  %p6813_p1 = scmp.lt.u32.totalorder %s4940_s14, %s8035_s1 }
   0x6   :  { %p6814_p2 = scmp.lt.u32.totalorder %s6834_s21, %s6834_s21  ;;  %p6816_p4 = scmp.lt.u32.totalorder %s6834_s21, %s4940_s14 }
   0x8   :  { %p6815_p3 = por %p6814_p2, %p6813_p1 }
   0xa   :  { %p6817_p5 = por %p6816_p4, %p6815_p3 }
   0xc   :  { %p6818_p6 = pnand %p6817_p5, %p6811_p0 }
   0xe   :  { %6821 = shalt.err (!%p6818_p6)
}
   0xf   :  { %s6822_s24 = scalar_lea.vmem %s33_s16, 4096  ;;  %p6827_p8 = scmp.lt.s32.totalorder %s33_s16, %s33_s16 }
  0x10   :  { %p6823_p7 = scmp.ne.s32.totalorder %s33_s16, %s6822_s24  ;;  %p6828_p9 = scmp.lt.s32.totalorder %s6822_s24, %s6822_s24 }
  0x12   :  { %p6829_p10 = por %p6828_p9, %p6827_p8 }
  0x14   :  { %p6830_p11 = pnand %p6829_p10, %p6823_p7 }
  0x16   :  { %6833 = shalt.err (!%p6830_p11)
}
  0x17   :  { %s6909_s25 = smov 64   ;;  %s6910_s26 = smov 4  }
  0x18   :  { %38 = dma.hbm_to_vmem [thread:$0]  %s4940_s14, 4096, %s33_s16, [#allocation6], %s6909_s25, %s6909_s25, %s6910_s26  }
  0x19   :  { %s6835_s28 = scalar_lea.hbm %s8034_s0, 4096  ;;  %s6837_s6 = scalar_lea.hbm %s8034_s0, 8192 }
  0x1a   :  { %p6836_p12 = scmp.ne.s32.totalorder %s8034_s0, %s6835_s28  ;;  %p6838_p13 = scmp.lt.u32.totalorder %s6837_s6, %s6835_s28 }
  0x1b   :  { %p6839_p0 = scmp.lt.u32.totalorder %s6835_s28, %s8034_s0 }
  0x1d   :  { %p6840_p1 = por %p6839_p0, %p6838_p13 }
  0x1f   :  { %p6841_p2 = pnand %p6840_p1, %p6836_p12 }
  0x21   :  { %6844 = shalt.err (!%p6841_p2)
}
  0x22   :  { %s6845_s9 = scalar_lea.vmem %s17_s18, 4096  ;;  %p6850_p4 = scmp.lt.s32.totalorder %s17_s18, %s17_s18 }
  0x23   :  { %p6846_p3 = scmp.ne.s32.totalorder %s17_s18, %s6845_s9  ;;  %p6851_p5 = scmp.lt.s32.totalorder %s6845_s9, %s6845_s9 }
  0x25   :  { %p6852_p6 = por %p6851_p5, %p6850_p4 }
  0x27   :  { %p6853_p7 = pnand %p6852_p6, %p6846_p3 }
  0x29   :  { %6856 = shalt.err (!%p6853_p7)
}
  0x2a   :  { %22 = dma.hbm_to_vmem [thread:$0]  %s8034_s0, 4096, %s17_s18, [#allocation3], %s6909_s25, %s6909_s25, %s6910_s26  }
  0x2b   :  { %s6911_s12 = smov [#allocation7]   ;;  %s6857_s16 = scalar_lea.hbm %s8036_s2, 9216 }
  0x2c   :  { %s44_s13 = sshll.u32 %s6911_s12, 4  ;;  %p6858_p8 = scmp.ne.s32.totalorder %s8036_s2, %s6857_s16  ;;  %s45_s13 = int_to_ptr.vmem [resolvable:$true] %s44_s13 }
  0x2d   :  { %p6861_p9 = scmp.lt.u32.totalorder %s6857_s16, %s8036_s2 }
  0x2f   :  { %p6863_p10 = pnand %p6861_p9, %p6858_p8 }
  0x31   :  { %6866 = shalt.err (!%p6863_p10)
}
  0x32   :  { %s6867_s22 = scalar_lea.vmem %s45_s13, 9216  ;;  %p6872_p12 = scmp.lt.s32.totalorder %s45_s13, %s45_s13 }
  0x33   :  { %p6868_p11 = scmp.ne.s32.totalorder %s45_s13, %s6867_s22  ;;  %p6873_p13 = scmp.lt.s32.totalorder %s6867_s22, %s6867_s22 }
  0x35   :  { %p6874_p0 = por %p6873_p13, %p6872_p12 }
  0x37   :  { %p6875_p1 = pnand %p6874_p0, %p6868_p11 }
  0x39   :  { %6878 = shalt.err (!%p6875_p1)
}
  0x3a   :  { %50 = dma.hbm_to_vmem [thread:$0]  %s8036_s2, 9216, %s45_s13, [#allocation6], %s6909_s25, %s6909_s25, %s6910_s26  }
  0x3b   :  { %6901 = dma.done.wait [#allocation3], 4096  }
  0x3c   :  { %6902 = vsyncadd [#allocation3], 4294963200 }
  0x3d   :  { %6903 = dma.done.wait [#allocation6], 13312  }
  0x3e   :  { %6904 = vsyncadd [#allocation6], 4294953984  ;;  %v6663_v0 = vld [vmem:[#allocation7 + $0x40] sm:$0xff]   ;;  %v6665_v2 = vld [vmem:[#allocation7 + $0x48] sm:$0xff]   ;;  %vm367_vm0 = vsmask.f32 7424 }
  0x3f   :  { %v6664_v1 = vld [vmem:[#allocation7 + $0x100] sm:$0xff]   ;;  %5407 = vmatprep.subr.bf16.mxu1 %v6663_v0  ;;  %v6666_v3 = vld [vmem:[#allocation7 + $0x108] sm:$0xff]   ;;  %v6667_v4 = vld [vmem:[#allocation7 + $0x50] sm:$0xff]   ;;  %vm2383_vm1 = vsmask.f32 256  ;;  %vm3351_vm2 = vcmask 1041408  }
  0x40   :  { %5727 = vmatprep.subr.bf16.mxu0 %v6664_v1  ;;  %5408 = vmatpush3.bf16.msra.mxu1 %v6663_v0  ;;  %v6668_v5 = vld [vmem:[#allocation7 + $0x110] sm:$0xff]   ;;  %v6669_v6 = vld [vmem:[#allocation7 + $0x58] sm:$0xff]   ;;  %v6671_v8 = vld [vmem:[#allocation7 + $0x60] sm:$0xff]   ;;  %vm1351_vm3 = vcmask 1046528   ;;  %vm3867_vm4 = vsmask.f32 1280 }
  0x41   :  { %5728 = vmatpush3.bf16.msra.mxu0 %v6664_v1  ;;  %5409 = vmatprep.subr.bf16.mxu1 %v6665_v2  ;;  %v6670_v7 = vld [vmem:[#allocation7 + $0x118] sm:$0xff]   ;;  %v6672_v9 = vld [vmem:[#allocation7 + $0x120] sm:$0xff]   ;;  %v6673_v10 = vld [vmem:[#allocation7 + $0x68] sm:$0xff]   ;;  %vm1867_vm5 = vcmask 1040384   ;;  %s6912_s2 = smov [#allocation8]  }
  0x42   :  { %5729 = vmatprep.subr.bf16.mxu0 %v6666_v3  ;;  %v6674_v11 = vld [vmem:[#allocation7 + $0x128] sm:$0xff]   ;;  %v6679_v12 = vld [vmem:[#allocation2] sm:$0xff]   ;;  %v6982_v14 = vld [vmem:[#allocation2 + $0x10] sm:$0xff]   ;;  %s4927_s23 = sshll.u32 %s6912_s2, 4  ;;  %s4928_s23 = int_to_ptr.vmem [resolvable:$true] %s4927_s23 }
  0x43   :  { %v6980_v13 = vld [vmem:[#allocation2 + $0x8] sm:$0xff]   ;;  %v369_v15 = vshrl.u32 %v6679_v12, 16  ;;  %v371_v16 = vshll.u32 %v6679_v12, 16  ;;  %v6675_v19 = vld [vmem:[#allocation7 + $0x70] sm:$0xff]   ;;  %v6991_v21 = vshrl.u32 %v6982_v14, 16  ;;  %v6677_v26 = vld [vmem:[#allocation7 + $0x78] sm:$0xff]   ;;  %p6884_p3 = scmp.lt.s32.totalorder %s4928_s23, %s4928_s23 }
  0x44   :  { %5410 = vmatpush3.bf16.msra.mxu1 %v6665_v2  ;;  %v6985_v17 = vshll.u32 %v6980_v13, 16  ;;  %v6988_v18 = vshrl.u32 %v6980_v13, 16  ;;  %v6676_v20 = vld [vmem:[#allocation7 + $0x130] sm:$0xff]   ;;  %v6997_v29 = vshll.u32 %v6982_v14, 16  ;;  %v6999_v30 = vld [vmem:[#allocation2 + $0x18] sm:$0xff]   ;;  %v7002_v32 = vld [vmem:[#allocation2 + $0x20] sm:$0xff]  }
  0x45   :  { %5730 = vmatpush3.bf16.msra.mxu0 %v6666_v3  ;;  %5411 = vmatprep.subr.bf16.mxu1 %v6667_v4  ;;  %v373_v22 = vrot.slane %v371_v16, 1  ;;  %v2384_v24 = vrot.slane %v369_v15, 7  ;;  %v2388_v31 = vrot.slane %v6991_v21, 7  ;;  %v6678_v33 = vld [vmem:[#allocation7 + $0x138] sm:$0xff]   ;;  %v7007_v36 = vshll.u32 %v6999_v30, 16  ;;  %v7012_v38 = vld [vmem:[#allocation2 + $0x28] sm:$0xff]  }
  0x46   :  { %5731 = vmatprep.subr.bf16.mxu0 %v6668_v5  ;;  %v378_v23 = vrot.slane %v6985_v17, 1  ;;  %v2385_v25 = vrot.slane %v6988_v18, 7  ;;  %v7010_v37 = vshrl.u32 %v6999_v30, 16  ;;  %v386_v40 = vrot.slane %v6997_v29, 1  ;;  %v6682_v41 = vld [vmem:[#allocation7] sm:$0xff]   ;;  %v6686_v52 = vld [vmem:[#allocation7 + $0x148] sm:$0xff]  }
  0x47   :  { %v374_v27 = vor.u32 %v373_v22, %v369_v15  ;;  %v2389_v42 = vor.u32 %v2388_v31, %v6997_v29  ;;  %v7019_v44 = vshrl.u32 %v7002_v32, 16  ;;  %v6683_v45 = vld [vmem:[#allocation7 + $0x140] sm:$0xff]   ;;  %v394_v47 = vrot.slane %v7007_v36, 1  ;;  %v7031_v53 = vld [vmem:[#allocation2 + $0x30] sm:$0xff]   ;;  %v7040_v59 = vld [vmem:[#allocation2 + $0x38] sm:$0xff]   ;;  %s6879_s24 = scalar_lea.vmem %s4928_s23, 8192 }
  0x48   :  { %5412 = vmatpush3.bf16.msra.mxu1 %v6667_v4  ;;  %v2386_v28 = vor.u32 %v2385_v25, %v6985_v17  ;;  %v382_v39 = vor.u32 %v6988_v18, %v378_v23  ;;  %v2391_v43 = vrot.slane %v7010_v37, 7  ;;  %v390_v46 = vor.u32 %v6991_v21, %v386_v40  ;;  %v6689_v62 = vld [vmem:[#allocation7 + $0x8] sm:$0xff]   ;;  %p6880_p2 = scmp.ne.s32.totalorder %s4928_s23, %s6879_s24  ;;  %p6885_p4 = scmp.lt.s32.totalorder %s6879_s24, %s6879_s24 }
  0x49   :  { %5732 = vmatpush3.bf16.msra.mxu0 %v6668_v5  ;;  %5413 = vmatprep.subr.bf16.mxu1 %v6669_v6  ;;  %v379_v34 = vsel %vm367_vm0, %v374_v27, %v378_v23  ;;  %v7024_v48 = vshrl.u32 %v7012_v38, 16  ;;  %v7028_v50 = vshll.u32 %v7002_v32, 16  ;;  %v2390_v54 = vsel %vm2383_vm1, %v2385_v25, %v2389_v42  ;;  %v6690_v5 = vld [vmem:[#allocation7 + $0x150] sm:$0xff]   ;;  %v7069_v23 = vld [vmem:[#allocation2 + $0x48] sm:$0xff]  }
  0x4a   :  { %5733 = vmatprep.subr.bf16.mxu0 %v6670_v7  ;;  %v2387_v35 = vsel %vm2383_vm1, %v2384_v24, %v2386_v28  ;;  %5423 = vmatprep.mubr.bf16.mxu1 %v379_v34  ;;  %v2392_v49 = vor.u32 %v2391_v43, %v7007_v36  ;;  %v387_v51 = vsel %vm367_vm0, %v382_v39, %v386_v40  ;;  %v2394_v55 = vrot.slane %v7019_v44, 7  ;;  %v6703_v39 = vld [vmem:[#allocation7 + $0x18] sm:$0xff]   ;;  %p6886_p5 = por %p6885_p4, %p6884_p3 }
  0x4b   :  { %5743 = vmatprep.mubr.bf16.mxu0 %v2387_v35  ;;  %v7036_v56 = vshll.u32 %v7012_v38, 16  ;;  %v395_v57 = vsel %vm367_vm0, %v390_v46, %v394_v47  ;;  %v2397_v58 = vrot.slane %v7024_v48, 7  ;;  %v402_v61 = vrot.slane %v7028_v50, 1  ;;  %v6697_v35 = vld [vmem:[#allocation7 + $0x160] sm:$0xff]  }
  0x4c   :  { %5414 = vmatpush3.bf16.msra.mxu1 %v6669_v6  ;;  %v2393_v60 = vsel %vm2383_vm1, %v2388_v31, %v2392_v49  ;;  %v398_v63 = vor.u32 %v7010_v37, %v394_v47  ;;  %v2395_v0 = vor.u32 %v2394_v55, %v7028_v50  ;;  %v7049_v3 = vshrl.u32 %v7031_v53, 16  ;;  %v7095_v49 = vld [vmem:[#allocation2 + $0x58] sm:$0xff]   ;;  %p6887_p6 = pnand %p6886_p5, %p6880_p2 }
  0x4d   :  { %5734 = vmatpush3.bf16.msra.mxu0 %v6670_v7  ;;  %5415 = vmatprep.subr.bf16.mxu1 %v6671_v8  ;;  %v406_v1 = vor.u32 %v7019_v44, %v402_v61  ;;  %v410_v2 = vrot.slane %v7036_v56, 1  ;;  %v2398_v4 = vor.u32 %v2397_v58, %v7036_v56  ;;  %v7053_v6 = vshrl.u32 %v7040_v59, 16  ;;  %v6696_v7 = vld [vmem:[#allocation7 + $0x10] sm:$0xff]  }
  0x4e   :  { %5735 = vmatprep.subr.bf16.mxu0 %v6672_v9  ;;  %v2396_v12 = vsel %vm2383_vm1, %v2391_v43, %v2395_v0  ;;  %v2400_v16 = vrot.slane %v7049_v3, 7  ;;  %v7081_v34 = vshrl.u32 %v7069_v23, 16  ;;  %v7088_v42 = vshll.u32 %v7069_v23, 16  ;;  %v7090_v43 = vld [vmem:[#allocation2 + $0x50] sm:$0xff]  }
  0x4f   :  { %v411_v15 = vsel %vm367_vm0, %v406_v1, %v410_v2  ;;  %v2403_v22 = vrot.slane %v7053_v6, 7  ;;  %v414_v25 = vor.u32 %v7024_v48, %v410_v2  ;;  %v7109_v0 = vshrl.u32 %v7095_v49, 16  ;;  %v6704_v1 = vld [vmem:[#allocation7 + $0x170] sm:$0xff]  }
  0x50   :  { %5416 = vmatpush3.bf16.msra.mxu1 %v6671_v8  ;;  %v7056_v8 = vshll.u32 %v7031_v53, 16  ;;  %v7112_v2 = vshll.u32 %v7090_v43, 16 }
  0x51   :  { %5736 = vmatpush3.bf16.msra.mxu0 %v6672_v9  ;;  %5417 = vmatprep.subr.bf16.mxu1 %v6673_v10  ;;  %v403_v9 = vsel %vm367_vm0, %v398_v63, %v402_v61  ;;  %8121 = vst [vmem:[#allocation12_spill] sm:$0xff] %v7109_v0 }
  0x52   :  { %5737 = vmatprep.subr.bf16.mxu0 %v6674_v11  ;;  %v418_v24 = vrot.slane %v7056_v8, 1 }
  0x54   :  { %5418 = vmatpush3.bf16.msra.mxu1 %v6673_v10  ;;  %v7060_v10 = vshll.u32 %v7040_v59, 16  ;;  %v422_v27 = vor.u32 %v7049_v3, %v418_v24 }
  0x55   :  { %5738 = vmatpush3.bf16.msra.mxu0 %v6674_v11  ;;  %5419 = vmatprep.subr.bf16.mxu1 %v6675_v19  ;;  %v7062_v11 = vld [vmem:[#allocation2 + $0x40] sm:$0xff]  }
  0x56   :  { %5739 = vmatprep.subr.bf16.mxu0 %v6676_v20  ;;  %v426_v28 = vrot.slane %v7060_v10, 1  ;;  %v7077_v31 = vshrl.u32 %v7062_v11, 16  ;;  %v7084_v40 = vshll.u32 %v7062_v11, 16 }
  0x58   :  { %5420 = vmatpush3.bf16.msra.mxu1 %v6675_v19  ;;  %v6693_v19 = vld [vmem:[#allocation7 + $0x158] sm:$0xff]   ;;  %v427_v46 = vsel %vm367_vm0, %v422_v27, %v426_v28  ;;  %v2406_v47 = vrot.slane %v7077_v31, 7 }
  0x59   :  { %5740 = vmatpush3.bf16.msra.mxu0 %v6676_v20  ;;  %5421 = vmatprep.subr.bf16.mxu1 %v6677_v26  ;;  %v2399_v20 = vsel %vm2383_vm1, %v2394_v55, %v2398_v4  ;;  %v434_v55 = vrot.slane %v7084_v40, 1  ;;  %v6710_v4 = vld [vmem:[#allocation7 + $0x20] sm:$0xff]  }
  0x5a   :  { %5741 = vmatprep.subr.bf16.mxu0 %v6678_v33 }
  0x5b   :  { %v438_v61 = vor.u32 %v7077_v31, %v434_v55 }
  0x5c   :  { %5422 = vmatpush3.bf16.msra.mxu1 %v6677_v26  ;;  %v2401_v26 = vor.u32 %v2400_v16, %v7056_v8 }
  0x5d   :  { %5742 = vmatpush3.bf16.msra.mxu0 %v6678_v33  ;;  %5487 = vmatprep.subr.bf16.mxu1 %v6682_v41  ;;  %v2404_v33 = vor.u32 %v2403_v22, %v7060_v10 }
  0x5e   :  { %5807 = vmatprep.subr.bf16.mxu0 %v6683_v45 }
  0x5f   :  { %5424 = vmatmul.mubr.bf16.vlgmr.msra.gmra.mrb[0].mxu1 %v387_v51  ;;  %v2405_v51 = vsel %vm2383_vm1, %v2400_v16, %v2404_v33  ;;  %v7121_v16 = vshll.u32 %v7095_v49, 16 }
  0x60   :  { %5744 = vmatmul.mubr.bf16.vlgmr.msra.gmra.mrb[0].mxu0 %v2390_v54  ;;  %5488 = vmatpush3.bf16.msra.mxu1 %v6682_v41  ;;  %v419_v41 = vsel %vm367_vm0, %v414_v25, %v418_v24  ;;  %v6700_v54 = vld [vmem:[#allocation7 + $0x168] sm:$0xff]   ;;  %v2415_v24 = vrot.slane %v7109_v0, 7  ;;  %v6707_v25 = vld [vmem:[#allocation7 + $0x178] sm:$0xff]  }
  0x61   :  { %5808 = vmatpush3.bf16.msra.mxu0 %v6683_v45  ;;  %5427 = vmatprep.mubr.bf16.mxu1 %v395_v57  ;;  %v2402_v45 = vsel %vm2383_vm1, %v2397_v58, %v2401_v26  ;;  %v430_v57 = vor.u32 %v7053_v6, %v426_v28  ;;  %v7102_v58 = vshrl.u32 %v7090_v43, 16  ;;  %8122 = vst [vmem:[#allocation13_spill] sm:$0xff] %v7121_v16  ;;  %v450_v26 = vrot.slane %v7112_v2, 1 }
  0x62   :  { %5747 = vmatprep.mubr.bf16.mxu0 %v2393_v60  ;;  %5809 = vmatprep.subr.bf16.mxu0 %v6686_v52  ;;  %v2407_v60 = vor.u32 %v2406_v47, %v7084_v40  ;;  %v458_v33 = vrot.slane %v7121_v16, 1 }
  0x63   :  { %5489 = vmatprep.subr.bf16.mxu1 %v6689_v62  ;;  %v454_v28 = vor.u32 %v7102_v58, %v450_v26 }
  0x64   :  { %5490 = vmatpush3.bf16.msra.mxu1 %v6689_v62  ;;  %v442_v62 = vrot.slane %v7088_v42, 1 }
  0x65   :  { %5810 = vmatpush3.bf16.msra.mxu0 %v6686_v52  ;;  %5491 = vmatprep.subr.bf16.mxu1 %v6696_v7  ;;  %v2409_v52 = vrot.slane %v7081_v34, 7 }
  0x66   :  { %5811 = vmatprep.subr.bf16.mxu0 %v6690_v5 }
  0x67   :  { %5428 = vmatmul.mubr.bf16.gmra.mrb[4].mxu1 %v403_v9  ;;  %v2410_v63 = vor.u32 %v2409_v52, %v7088_v42  ;;  %v7116_v9 = vld [vmem:[#allocation2 + $0x60] sm:$0xff]  }
  0x68   :  { %5748 = vmatmul.mubr.bf16.gmra.mrb[4].mxu0 %v2396_v12  ;;  %5431 = vmatprep.mubr.bf16.mxu1 %v411_v15  ;;  %v2408_v12 = vsel %vm2383_vm1, %v2403_v22, %v2407_v60  ;;  %v443_v15 = vsel %vm367_vm0, %v438_v61, %v442_v62  ;;  %v446_v22 = vor.u32 %v7081_v34, %v442_v62  ;;  %v7151_v61 = vld [vmem:[#allocation2 + $0x70] sm:$0xff]  }
  0x69   :  { %5751 = vmatprep.mubr.bf16.mxu0 %v2399_v20  ;;  %5812 = vmatpush3.bf16.msra.mxu0 %v6690_v5  ;;  %v435_v5 = vsel %vm367_vm0, %v430_v57, %v434_v55  ;;  %v2411_v20 = vsel %vm2383_vm1, %v2406_v47, %v2410_v63  ;;  %v7142_v47 = vshll.u32 %v7116_v9, 16  ;;  %v459_v57 = vsel %vm367_vm0, %v454_v28, %v458_v33 }
  0x6a   :  { %5813 = vmatprep.subr.bf16.mxu0 %v6693_v19  ;;  %5492 = vmatpush3.bf16.msra.mxu1 %v6696_v7  ;;  %v2412_v7 = vrot.slane %v7102_v58, 7 }
  0x6b   :  { %5493 = vmatprep.subr.bf16.mxu1 %v6703_v39  ;;  %8125 = vst [vmem:[#allocation16_spill] sm:$0xff] %v7142_v47 }
  0x6c   :  { %v2413_v27 = vor.u32 %v2412_v7, %v7112_v2 }
  0x6d   :  { %5814 = vmatpush3.bf16.msra.mxu0 %v6693_v19  ;;  %v7123_v19 = vld [vmem:[#allocation2 + $0x68] sm:$0xff]  }
  0x6e   :  { %5815 = vmatprep.subr.bf16.mxu0 %v6697_v35  ;;  %5494 = vmatpush3.bf16.msra.mxu1 %v6703_v39  ;;  %v2416_v39 = vor.u32 %v2415_v24, %v7121_v16  ;;  %v2414_v55 = vsel %vm2383_vm1, %v2409_v52, %v2413_v27  ;;  %v462_v52 = vor.u32 %v7109_v0, %v458_v33  ;;  %v3373_v0 = vrot.slane %v7116_v9, 6 }
  0x6f   :  { %5432 = vmatmul.mubr.bf16.gmra.mrb[8].mxu1 %v419_v41  ;;  %5495 = vmatprep.subr.bf16.mxu1 %v6710_v4  ;;  %v7137_v41 = vshrl.u32 %v7123_v19, 16 }
  0x70   :  { %5752 = vmatmul.mubr.bf16.gmra.mrb[8].mxu0 %v2402_v45  ;;  %5435 = vmatprep.mubr.bf16.mxu1 %v427_v46  ;;  %v7139_v45 = vld [vmem:[#allocation7 + $0x180] sm:$0xff]   ;;  %v6716_v46 = vld [vmem:[#allocation7 + $0x28] sm:$0xff]   ;;  %v2417_v62 = vsel %vm2383_vm1, %v2412_v7, %v2416_v39 }
  0x71   :  { %5755 = vmatprep.mubr.bf16.mxu0 %v2405_v51  ;;  %5816 = vmatpush3.bf16.msra.mxu0 %v6697_v35  ;;  %v7133_v35 = vshrl.u32 %v7116_v9, 16  ;;  %8124 = vst [vmem:[#allocation15_spill] sm:$0xff] %v7137_v41  ;;  %v451_v51 = vsel %vm367_vm0, %v446_v22, %v450_v26  ;;  %v2421_v63 = vrot.slane %v7137_v41, 7  ;;  %v7171_v22 = vshll.u32 %v7151_v61, 16 }
  0x72   :  { %5817 = vmatprep.subr.bf16.mxu0 %v6700_v54  ;;  %5496 = vmatpush3.bf16.msra.mxu1 %v6710_v4  ;;  %v466_v4 = vrot.slane %v7142_v47, 1 }
  0x73   :  { %8123 = vst [vmem:[#allocation14_spill] sm:$0xff] %v7133_v35  ;;  %5497 = vmatprep.subr.bf16.mxu1 %v6716_v46  ;;  %v2418_v60 = vrot.slane %v7133_v35, 7  ;;  %8129 = vst [vmem:[#allocation20_spill] sm:$0xff] %v7171_v22 }
  0x74   :  { %v467_v27 = vsel %vm367_vm0, %v462_v52, %v466_v4  ;;  %v6728_v52 = vld [vmem:[#allocation7 + $0x38] sm:$0xff]  }
  0x75   :  { %5818 = vmatpush3.bf16.msra.mxu0 %v6700_v54  ;;  %v7146_v54 = vshll.u32 %v7123_v19, 16 }
  0x76   :  { %5819 = vmatprep.subr.bf16.mxu0 %v6704_v1  ;;  %5498 = vmatpush3.bf16.msra.mxu1 %v6716_v46 }
  0x77   :  { %5436 = vmatmul.mubr.bf16.gmra.mrb[12].mxu1 %v435_v5  ;;  %8126 = vst [vmem:[#allocation17_spill] sm:$0xff] %v7146_v54  ;;  %v2419_v5 = vor.u32 %v2418_v60, %v7142_v47  ;;  %v474_v7 = vrot.slane %v7146_v54, 1 }
  0x78   :  { %5756 = vmatmul.mubr.bf16.gmra.mrb[12].mxu0 %v2408_v12  ;;  %5439 = vmatprep.mubr.bf16.mxu1 %v443_v15  ;;  %v470_v12 = vor.u32 %v7133_v35, %v466_v4  ;;  %v7164_v15 = vshrl.u32 %v7151_v61, 16  ;;  %v7186_v4 = vld [vmem:[#allocation2 + $0x88] sm:$0xff]  }
  0x79   :  { %5759 = vmatprep.mubr.bf16.mxu0 %v2411_v20  ;;  %5820 = vmatpush3.bf16.msra.mxu0 %v6704_v1  ;;  %v7155_v1 = vld [vmem:[#allocation2 + $0x78] sm:$0xff]   ;;  %v6722_v20 = vld [vmem:[#allocation7 + $0x30] sm:$0xff]   ;;  %v2420_v28 = vsel %vm2383_vm1, %v2415_v24, %v2419_v5  ;;  %v478_v24 = vor.u32 %v7137_v41, %v474_v7  ;;  %v6751_v35 = vld [vmem:[#allocation7 + $0x1e8] sm:$0xff]  }
  0x7a   :  { %5821 = vmatprep.subr.bf16.mxu0 %v6707_v25  ;;  %8127 = vst [vmem:[#allocation18_spill] sm:$0xff] %v7164_v15  ;;  %v7168_v26 = vshrl.u32 %v7155_v1, 16  ;;  %5499 = vmatprep.subr.bf16.mxu1 %v6722_v20  ;;  %v475_v33 = vsel %vm367_vm0, %v470_v12, %v474_v7  ;;  %v2424_v39 = vrot.slane %v7164_v15, 7  ;;  %v7178_v46 = vshll.u32 %v7155_v1, 16  ;;  %v7198_v7 = vld [vmem:[#allocation2 + $0x90] sm:$0xff]  }
  0x7b   :  { %5500 = vmatpush3.bf16.msra.mxu1 %v6722_v20 }
  0x7c   :  { %8128 = vst [vmem:[#allocation19_spill] sm:$0xff] %v7168_v26  ;;  %8130 = vst [vmem:[#allocation21_spill] sm:$0xff] %v7178_v46  ;;  %v2425_v5 = vor.u32 %v2424_v39, %v7171_v22  ;;  %v490_v20 = vrot.slane %v7178_v46, 1  ;;  %5501 = vmatprep.subr.bf16.mxu1 %v6728_v52 }
  0x7d   :  { %5822 = vmatpush3.bf16.msra.mxu0 %v6707_v25  ;;  %v2422_v25 = vor.u32 %v2421_v63, %v7146_v54  ;;  %v7207_v54 = vshll.u32 %v7186_v4, 16 }
  0x7e   :  { %5887 = vmatprep.subr.bf16.mxu0 %v7139_v45 }
  0x7f   :  { %5440 = vmatmul.mubr.bf16.gmra.mrb[16].mxu1 %v451_v51  ;;  %v7180_v51 = vld [vmem:[#allocation2 + $0x80] sm:$0xff]   ;;  %8133 = vst [vmem:[#allocation24_spill] sm:$0xff] %v7207_v54 }
  0x80   :  { %5760 = vmatmul.mubr.bf16.gmra.mrb[16].mxu0 %v2414_v55  ;;  %5443 = vmatprep.mubr.bf16.mxu1 %v459_v57  ;;  %v2423_v55 = vsel %vm2383_vm1, %v2418_v60, %v2422_v25  ;;  %v2427_v57 = vrot.slane %v7168_v26, 7  ;;  %v7192_v60 = vshrl.u32 %v7180_v51, 16 }
  0x81   :  { %5763 = vmatprep.mubr.bf16.mxu0 %v2417_v62  ;;  %v482_v62 = vrot.slane %v7171_v22, 1  ;;  %5502 = vmatpush3.bf16.msra.mxu1 %v6728_v52 }
  0x82   :  { %8131 = vst [vmem:[#allocation22_spill] sm:$0xff] %v7192_v60  ;;  %v2428_v25 = vor.u32 %v2427_v57, %v7178_v46 }
  0x83   :  { %v486_v12 = vor.u32 %v7164_v15, %v482_v62  ;;  %v8043_v15 = vrot.slane %v7192_v60, 7 }
  0x84   :  { %v2429_v46 = vsel %vm2383_vm1, %v2424_v39, %v2428_v25  ;;  %v7227_v25 = vshrl.u32 %v7198_v7, 16 }
  0x85   :  { %v491_v22 = vsel %vm367_vm0, %v486_v12, %v490_v20  ;;  %v7224_v12 = vshrl.u32 %v7186_v4, 16 }
  0x86   :  { %8136 = vst [vmem:[#allocation27_spill] sm:$0xff] %v7227_v25 }
  0x87   :  { %5444 = vmatmul.mubr.bf16.gmra.mrb[20].mxu1 %v467_v27  ;;  %v7196_v27 = vshll.u32 %v7180_v51, 16  ;;  %8135 = vst [vmem:[#allocation26_spill] sm:$0xff] %v7224_v12 }
  0x88   :  { %5764 = vmatmul.mubr.bf16.gmra.mrb[20].mxu0 %v2420_v28  ;;  %5447 = vmatprep.mubr.bf16.mxu1 %v475_v33  ;;  %v483_v28 = vsel %vm367_vm0, %v478_v24, %v482_v62  ;;  %v7201_v33 = vld [vmem:[#allocation7 + $0x80] sm:$0xff]   ;;  %v7213_v62 = vshll.u32 %v7198_v7, 16  ;;  %v7215_v24 = vld [vmem:[#allocation2 + $0x98] sm:$0xff]  }
  0x89   :  { %5767 = vmatprep.mubr.bf16.mxu0 %v2423_v55  ;;  %8132 = vst [vmem:[#allocation23_spill] sm:$0xff] %v7196_v27  ;;  %v2426_v55 = vsel %vm2383_vm1, %v2421_v63, %v2425_v5  ;;  %v498_v41 = vrot.slane %v7196_v27, 1  ;;  %5567 = vmatprep.subr.bf16.mxu1 %v7201_v33  ;;  %v494_v63 = vor.u32 %v7168_v26, %v490_v20  ;;  %v506_v5 = vrot.slane %v7207_v54, 1 }
  0x8a   :  { %8134 = vst [vmem:[#allocation25_spill] sm:$0xff] %v7213_v62  ;;  %v2431_v52 = vor.u32 %v8043_v15, %v7196_v27  ;;  %v7239_v15 = vld [vmem:[#allocation2 + $0xa8] sm:$0xff]  }
  0x8b   :  { %v502_v39 = vor.u32 %v7192_v60, %v498_v41  ;;  %v499_v20 = vsel %vm367_vm0, %v494_v63, %v498_v41  ;;  %v510_v60 = vor.u32 %v7224_v12, %v506_v5  ;;  %v7252_v63 = vshll.u32 %v7239_v15, 16 }
  0x8c   :  { %v2432_v54 = vsel %vm2383_vm1, %v2427_v57, %v2431_v52  ;;  %v7256_v52 = vld [vmem:[#allocation2 + $0xb0] sm:$0xff]   ;;  %v7265_v12 = vshrl.u32 %v7239_v15, 16 }
  0x8d   :  { %v507_v27 = vsel %vm367_vm0, %v502_v39, %v506_v5  ;;  %8141 = vst [vmem:[#allocation32_spill] sm:$0xff] %v7252_v63 }
  0x8e   :  { %8142 = vst [vmem:[#allocation33_spill] sm:$0xff] %v7265_v12 }
  0x8f   :  { %5448 = vmatmul.mubr.bf16.gmra.mrb[24].mxu1 %v483_v28  ;;  %v7229_v28 = vld [vmem:[#allocation2 + $0xa0] sm:$0xff]  }
  0x90   :  { %5768 = vmatmul.mubr.bf16.gmra.mrb[24].mxu0 %v2426_v55  ;;  %5451 = vmatprep.mubr.bf16.mxu1 %v491_v22  ;;  %v514_v22 = vrot.slane %v7213_v62, 1  ;;  %v7237_v55 = vshrl.u32 %v7215_v24, 16  ;;  %v7246_v26 = vshll.u32 %v7229_v28, 16  ;;  %v7249_v41 = vshrl.u32 %v7229_v28, 16 }
  0x91   :  { %5771 = vmatprep.mubr.bf16.mxu0 %v2429_v46  ;;  %v7233_v46 = vshll.u32 %v7215_v24, 16 }
  0x92   :  { %8138 = vst [vmem:[#allocation29_spill] sm:$0xff] %v7237_v55  ;;  %8139 = vst [vmem:[#allocation30_spill] sm:$0xff] %v7246_v26  ;;  %v518_v57 = vor.u32 %v7227_v25, %v514_v22  ;;  %v530_v5 = vrot.slane %v7246_v26, 1  ;;  %v7284_v26 = vld [vmem:[#allocation2 + $0xc0] sm:$0xff]  }
  0x93   :  { %8137 = vst [vmem:[#allocation28_spill] sm:$0xff] %v7233_v46  ;;  %v522_v62 = vrot.slane %v7233_v46, 1  ;;  %8140 = vst [vmem:[#allocation31_spill] sm:$0xff] %v7249_v41  ;;  %v538_v46 = vrot.slane %v7252_v63, 1  ;;  %v6723_v63 = vld [vmem:[#allocation7 + $0x190] sm:$0xff]  }
  0x95   :  { %v523_v39 = vsel %vm367_vm0, %v518_v57, %v522_v62  ;;  %v534_v57 = vor.u32 %v7249_v41, %v530_v5  ;;  %v7289_v41 = vld [vmem:[#allocation2 + $0xc8] sm:$0xff]  }
  0x97   :  { %5452 = vmatmul.mubr.bf16.gmra.mrb[28].mxu1 %v499_v20  ;;  %v7261_v20 = vld [vmem:[#allocation2 + $0xb8] sm:$0xff]  }
  0x98   :  { %5772 = vmatmul.mubr.bf16.gmra.mrb[28].mxu0 %v2432_v54  ;;  %5455 = vmatprep.mubr.bf16.mxu1 %v507_v27  ;;  %v515_v54 = vsel %vm367_vm0, %v510_v60, %v514_v22  ;;  %v6717_v27 = vld [vmem:[#allocation7 + $0x188] sm:$0xff]   ;;  %v7270_v60 = vshll.u32 %v7256_v52, 16  ;;  %v7273_v22 = vshrl.u32 %v7256_v52, 16 }
  0x99   :  { %5823 = vmatprep.mubr.bf16.mxu0 %v6980_v13  ;;  %v526_v13 = vor.u32 %v7237_v55, %v522_v62  ;;  %v539_v62 = vsel %vm367_vm0, %v534_v57, %v538_v46  ;;  %v6729_v55 = vld [vmem:[#allocation7 + $0x198] sm:$0xff]  }
  0x9a   :  { %8143 = vst [vmem:[#allocation34_spill] sm:$0xff] %v7270_v60  ;;  %8144 = vst [vmem:[#allocation35_spill] sm:$0xff] %v7273_v22 }
  0x9f   :  { %5456 = vmatmul.mubr.bf16.gmra.mrb[32].mxu1 %v515_v54  ;;  %v7279_v54 = vshll.u32 %v7261_v20, 16 }
  0xa0   :  { %5824 = vmatmul.mubr.bf16.vlgmr.msra.gmra.mrb[0].mxu0 %v6982_v14  ;;  %5459 = vmatprep.mubr.bf16.mxu1 %v523_v39  ;;  %v531_v14 = vsel %vm367_vm0, %v526_v13, %v530_v5  ;;  %v546_v39 = vrot.slane %v7270_v60, 1  ;;  %v7294_v13 = vshll.u32 %v7284_v26, 16  ;;  %v7315_v60 = vld [vmem:[#allocation2 + $0xd8] sm:$0xff]  }
  0xa1   :  { %5888 = vmatpush3.bf16.msra.mxu0 %v7139_v45  ;;  %5827 = vmatprep.mubr.bf16.mxu0 %v6999_v30  ;;  %8145 = vst [vmem:[#allocation36_spill] sm:$0xff] %v7279_v54  ;;  %v542_v30 = vor.u32 %v7265_v12, %v538_v46  ;;  %v554_v45 = vrot.slane %v7279_v54, 1  ;;  %v7308_v54 = vld [vmem:[#allocation2 + $0xd0] sm:$0xff]  }
  0xa2   :  { %5889 = vmatprep.subr.bf16.mxu0 %v6717_v27  ;;  %v550_v5 = vor.u32 %v7273_v22, %v546_v39  ;;  %8146 = vst [vmem:[#allocation37_spill] sm:$0xff] %v7294_v13  ;;  %v7366_v22 = vld [vmem:[#allocation2 + $0xf8] sm:$0xff]  }
  0xa3   :  { %v547_v57 = vsel %vm367_vm0, %v542_v30, %v546_v39  ;;  %v7392_v25 = vshrl.u32 %v7366_v22, 16 }
  0xa4   :  { %v555_v46 = vsel %vm367_vm0, %v550_v5, %v554_v45 }
  0xa5   :  { %5890 = vmatpush3.bf16.msra.mxu0 %v6717_v27  ;;  %v6733_v27 = vld [vmem:[#allocation7 + $0x1a0] sm:$0xff]   ;;  %8162 = vst [vmem:[#allocation53_spill] sm:$0xff] %v7392_v25 }
  0xa6   :  { %5891 = vmatprep.subr.bf16.mxu0 %v6723_v63 }
  0xa7   :  { %5460 = vmatmul.mubr.bf16.gmra.mrb[36].mxu1 %v531_v14  ;;  %v7302_v14 = vshrl.u32 %v7284_v26, 16 }
  0xa8   :  { %5828 = vmatmul.mubr.bf16.gmra.mrb[4].mxu0 %v7002_v32  ;;  %5463 = vmatprep.mubr.bf16.mxu1 %v539_v62  ;;  %v7298_v32 = vshrl.u32 %v7261_v20, 16  ;;  %v562_v62 = vrot.slane %v7294_v13, 1 }
  0xa9   :  { %5831 = vmatprep.mubr.bf16.mxu0 %v7012_v38  ;;  %5892 = vmatpush3.bf16.msra.mxu0 %v6723_v63  ;;  %8148 = vst [vmem:[#allocation39_spill] sm:$0xff] %v7302_v14  ;;  %v7305_v38 = vshll.u32 %v7289_v41, 16  ;;  %v6735_v63 = vld [vmem:[#allocation7 + $0x1a8] sm:$0xff]  }
  0xaa   :  { %5893 = vmatprep.subr.bf16.mxu0 %v6729_v55  ;;  %8147 = vst [vmem:[#allocation38_spill] sm:$0xff] %v7298_v32  ;;  %v558_v39 = vor.u32 %v7298_v32, %v554_v45  ;;  %v566_v30 = vor.u32 %v7302_v14, %v562_v62  ;;  %v7332_v14 = vld [vmem:[#allocation2 + $0xe0] sm:$0xff]   ;;  %v7339_v32 = vld [vmem:[#allocation2 + $0xe8] sm:$0xff]  }
  0xab   :  { %8149 = vst [vmem:[#allocation40_spill] sm:$0xff] %v7305_v38  ;;  %v570_v5 = vrot.slane %v7305_v38, 1 }
  0xac   :  { %v563_v13 = vsel %vm367_vm0, %v558_v39, %v562_v62 }
  0xad   :  { %5894 = vmatpush3.bf16.msra.mxu0 %v6729_v55  ;;  %v6737_v55 = vld [vmem:[#allocation7 + $0x1b0] sm:$0xff]   ;;  %v571_v45 = vsel %vm367_vm0, %v566_v30, %v570_v5 }
  0xae   :  { %5895 = vmatprep.subr.bf16.mxu0 %v6733_v27 }
  0xaf   :  { %5464 = vmatmul.mubr.bf16.gmra.mrb[40].mxu1 %v547_v57  ;;  %v7318_v57 = vshll.u32 %v7308_v54, 16 }
  0xb0   :  { %5832 = vmatmul.mubr.bf16.gmra.mrb[8].mxu0 %v7031_v53  ;;  %5467 = vmatprep.mubr.bf16.mxu1 %v555_v46  ;;  %v7322_v53 = vshrl.u32 %v7289_v41, 16  ;;  %v7329_v46 = vshll.u32 %v7315_v60, 16 }
  0xb1   :  { %5835 = vmatprep.mubr.bf16.mxu0 %v7040_v59  ;;  %5896 = vmatpush3.bf16.msra.mxu0 %v6733_v27  ;;  %8150 = vst [vmem:[#allocation41_spill] sm:$0xff] %v7318_v57  ;;  %v7326_v59 = vshrl.u32 %v7308_v54, 16  ;;  %v6739_v27 = vld [vmem:[#allocation7 + $0x1b8] sm:$0xff]   ;;  %v578_v38 = vrot.slane %v7318_v57, 1 }
  0xb2   :  { %5897 = vmatprep.subr.bf16.mxu0 %v6735_v63  ;;  %8151 = vst [vmem:[#allocation42_spill] sm:$0xff] %v7322_v53  ;;  %8153 = vst [vmem:[#allocation44_spill] sm:$0xff] %v7329_v46  ;;  %v574_v62 = vor.u32 %v7322_v53, %v570_v5  ;;  %v586_v30 = vrot.slane %v7329_v46, 1  ;;  %v7355_v46 = vshll.u32 %v7339_v32, 16  ;;  %v7359_v53 = vld [vmem:[#allocation2 + $0xf0] sm:$0xff]  }
  0xb3   :  { %8152 = vst [vmem:[#allocation43_spill] sm:$0xff] %v7326_v59  ;;  %v582_v39 = vor.u32 %v7326_v59, %v578_v38  ;;  %v7352_v59 = vshrl.u32 %v7332_v14, 16 }
  0xb4   :  { %v579_v57 = vsel %vm367_vm0, %v574_v62, %v578_v38  ;;  %8157 = vst [vmem:[#allocation48_spill] sm:$0xff] %v7355_v46 }
  0xb5   :  { %5898 = vmatpush3.bf16.msra.mxu0 %v6735_v63  ;;  %v7344_v63 = vshll.u32 %v7332_v14, 16  ;;  %v587_v5 = vsel %vm367_vm0, %v582_v39, %v586_v30  ;;  %8156 = vst [vmem:[#allocation47_spill] sm:$0xff] %v7352_v59  ;;  %v602_v39 = vrot.slane %v7355_v46, 1 }
  0xb6   :  { %5899 = vmatprep.subr.bf16.mxu0 %v6737_v55 }
  0xb7   :  { %5468 = vmatmul.mubr.bf16.gmra.mrb[44].mxu1 %v563_v13  ;;  %v7341_v13 = vld [vmem:[#allocation7 + $0x1c0] sm:$0xff]   ;;  %8154 = vst [vmem:[#allocation45_spill] sm:$0xff] %v7344_v63 }
  0xb8   :  { %5836 = vmatmul.mubr.bf16.gmra.mrb[12].mxu0 %v7062_v11  ;;  %5471 = vmatprep.mubr.bf16.mxu1 %v571_v45  ;;  %v7348_v45 = vshrl.u32 %v7315_v60, 16 }
  0xb9   :  { %5839 = vmatprep.mubr.bf16.mxu0 %v7069_v23  ;;  %5900 = vmatpush3.bf16.msra.mxu0 %v6737_v55  ;;  %v594_v55 = vrot.slane %v7344_v63, 1  ;;  %v7373_v63 = vshrl.u32 %v7339_v32, 16 }
  0xba   :  { %5901 = vmatprep.subr.bf16.mxu0 %v6739_v27  ;;  %8155 = vst [vmem:[#allocation46_spill] sm:$0xff] %v7348_v45  ;;  %v590_v38 = vor.u32 %v7348_v45, %v586_v30  ;;  %v7377_v30 = vshrl.u32 %v7359_v53, 16  ;;  %v7380_v45 = vshll.u32 %v7366_v22, 16 }
  0xbb   :  { %v598_v62 = vor.u32 %v7352_v59, %v594_v55  ;;  %8159 = vst [vmem:[#allocation50_spill] sm:$0xff] %v7373_v63  ;;  %v606_v59 = vor.u32 %v7373_v63, %v602_v39  ;;  %v6745_v63 = vld [vmem:[#allocation7 + $0x1d0] sm:$0xff]  }
  0xbc   :  { %8160 = vst [vmem:[#allocation51_spill] sm:$0xff] %v7377_v30  ;;  %8161 = vst [vmem:[#allocation52_spill] sm:$0xff] %v7380_v45 }
  0xbd   :  { %5902 = vmatpush3.bf16.msra.mxu0 %v6739_v27  ;;  %v7369_v27 = vshll.u32 %v7359_v53, 16 }
  0xbe   :  { %5967 = vmatprep.subr.bf16.mxu0 %v7341_v13 }
  0xbf   :  { %5472 = vmatmul.mubr.bf16.gmra.mrb[48].mxu1 %v579_v57  ;;  %8158 = vst [vmem:[#allocation49_spill] sm:$0xff] %v7369_v27  ;;  %v595_v57 = vsel %vm367_vm0, %v590_v38, %v594_v55  ;;  %v610_v46 = vrot.slane %v7369_v27, 1  ;;  %v7385_v55 = vld [vmem:[#allocation5] sm:$0xff]  }
  0xc0   :  { %5840 = vmatmul.mubr.bf16.gmra.mrb[16].mxu0 %v7090_v43  ;;  %5475 = vmatprep.mubr.bf16.mxu1 %v587_v5  ;;  %v603_v5 = vsel %vm367_vm0, %v598_v62, %v602_v39  ;;  %v618_v62 = vrot.slane %v7380_v45, 1  ;;  %v7429_v45 = vld [vmem:[#allocation2 + $0x30] sm:$0xff]  }
  0xc1   :  { %5843 = vmatprep.mubr.bf16.mxu0 %v7095_v49  ;;  %v614_v38 = vor.u32 %v7377_v30, %v610_v46  ;;  %v611_v12 = vsel %vm367_vm0, %v606_v59, %v610_v46  ;;  %v7404_v46 = vld [vmem:[#allocation2] sm:$0xff]  }
  0xc2   :  { %v622_v39 = vor.u32 %v7392_v25, %v618_v62  ;;  %v7433_v25 = vld [vmem:[#allocation2 + $0x38] sm:$0xff]   ;;  %v7439_v30 = vld [vmem:[#allocation7 + $0xc0] sm:$0xff]  }
  0xc7   :  { %5476 = vmatmul.mubr.bf16.gmra.mrb[52].mxu1 %v595_v57  ;;  %v7395_v57 = vshll.u32 %v7385_v55, 16 }
  0xc8   :  { %5844 = vmatmul.mubr.bf16.gmra.mrb[20].mxu0 %v7116_v9  ;;  %5479 = vmatprep.mubr.bf16.mxu1 %v603_v5  ;;  %v619_v5 = vsel %vm367_vm0, %v614_v38, %v618_v62  ;;  %v7408_v38 = vld [vmem:[#allocation2 + $0x8] sm:$0xff]   ;;  %v7413_v62 = vld [vmem:[#allocation2 + $0x10] sm:$0xff]  }
  0xc9   :  { %5847 = vmatprep.mubr.bf16.mxu0 %v7123_v19  ;;  %8163 = vst [vmem:[#allocation54_spill] sm:$0xff] %v7395_v57  ;;  %v626_v27 = vrot.slane %v7395_v57, 1  ;;  %v7425_v57 = vld [vmem:[#allocation2 + $0x28] sm:$0xff]  }
  0xcb   :  { %v627_v59 = vsel %vm367_vm0, %v622_v39, %v626_v27  ;;  %v6736_v27 = vld [vmem:[#allocation7 + $0x90] sm:$0xff]   ;;  %v7417_v39 = vld [vmem:[#allocation2 + $0x18] sm:$0xff]  }
  0xcf   :  { %5480 = vmatmul.mubr.bf16.gmra.mrb[56].mxu1 %v611_v12  ;;  %v6734_v12 = vld [vmem:[#allocation7 + $0x88] sm:$0xff]  }
  0xd0   :  { %5848 = vmatmul.mubr.bf16.gmra.mrb[24].mxu0 %v7151_v61  ;;  %5483 = vmatprep.mubr.bf16.mxu1 %v619_v5  ;;  %v6738_v5 = vld [vmem:[#allocation7 + $0x98] sm:$0xff]  }
  0xd1   :  { %5851 = vmatprep.mubr.bf16.mxu0 %v7155_v1 }
  0xd7   :  { %5484 = vmatmul.mubr.bf16.gmra.mrb[60].mxu1 %v627_v59  ;;  %v7421_v59 = vld [vmem:[#allocation2 + $0x20] sm:$0xff]  }
  0xd8   :  { %5852 = vmatmul.mubr.bf16.gmra.mrb[28].mxu0 %v7180_v51  ;;  %5503 = vmatprep.mubr.bf16.mxu1 %v7404_v46 }
  0xd9   :  { %5855 = vmatprep.mubr.bf16.mxu0 %v7186_v4 }
  0xdf   :  { %5504 = vmatmul.mubr.bf16.vlgmr.msra.gmra.mrb[0].mxu1 %v7408_v38 }
  0xe0   :  { %5856 = vmatmul.mubr.bf16.gmra.mrb[32].mxu0 %v7198_v7  ;;  %5568 = vmatpush3.bf16.msra.mxu1 %v7201_v33  ;;  %v6740_v33 = vld [vmem:[#allocation7 + $0xa0] sm:$0xff]  }
  0xe1   :  { %5507 = vmatprep.mubr.bf16.mxu1 %v7413_v62  ;;  %5859 = vmatprep.mubr.bf16.mxu0 %v7215_v24 }
  0xe2   :  { %5569 = vmatprep.subr.bf16.mxu1 %v6734_v12 }
  0xe4   :  { %5570 = vmatpush3.bf16.msra.mxu1 %v6734_v12  ;;  %v6742_v12 = vld [vmem:[#allocation7 + $0xa8] sm:$0xff]  }
  0xe5   :  { %5571 = vmatprep.subr.bf16.mxu1 %v6736_v27 }
  0xe7   :  { %5508 = vmatmul.mubr.bf16.gmra.mrb[4].mxu1 %v7417_v39 }
  0xe8   :  { %5860 = vmatmul.mubr.bf16.gmra.mrb[36].mxu0 %v7229_v28  ;;  %5511 = vmatprep.mubr.bf16.mxu1 %v7421_v59 }
  0xe9   :  { %5863 = vmatprep.mubr.bf16.mxu0 %v7239_v15  ;;  %5572 = vmatpush3.bf16.msra.mxu1 %v6736_v27  ;;  %v6744_v27 = vld [vmem:[#allocation7 + $0xb0] sm:$0xff]  }
  0xea   :  { %5573 = vmatprep.subr.bf16.mxu1 %v6738_v5 }
  0xed   :  { %5574 = vmatpush3.bf16.msra.mxu1 %v6738_v5  ;;  %v6746_v5 = vld [vmem:[#allocation7 + $0xb8] sm:$0xff]  }
  0xee   :  { %5575 = vmatprep.subr.bf16.mxu1 %v6740_v33 }
  0xef   :  { %5512 = vmatmul.mubr.bf16.gmra.mrb[8].mxu1 %v7425_v57 }
  0xf0   :  { %5864 = vmatmul.mubr.bf16.gmra.mrb[40].mxu0 %v7256_v52  ;;  %5515 = vmatprep.mubr.bf16.mxu1 %v7429_v45 }
  0xf1   :  { %5867 = vmatprep.mubr.bf16.mxu0 %v7261_v20  ;;  %5576 = vmatpush3.bf16.msra.mxu1 %v6740_v33  ;;  %v3357_v33 = vrot.slane %v7421_v59, 6 }
  0xf2   :  { %5577 = vmatprep.subr.bf16.mxu1 %v6742_v12 }
  0xf5   :  { %5578 = vmatpush3.bf16.msra.mxu1 %v6742_v12 }
  0xf6   :  { %5579 = vmatprep.subr.bf16.mxu1 %v6744_v27 }
  0xf7   :  { %5516 = vmatmul.mubr.bf16.gmra.mrb[12].mxu1 %v7433_v25 }
  0xf8   :  { %5868 = vmatmul.mubr.bf16.gmra.mrb[44].mxu0 %v7284_v26  ;;  %5519 = vmatprep.mubr.bf16.mxu1 %v7062_v11  ;;  %v3352_v11 = vrot.slane %v7408_v38, 6 }
  0xf9   :  { %5871 = vmatprep.mubr.bf16.mxu0 %v7289_v41  ;;  %5580 = vmatpush3.bf16.msra.mxu1 %v6744_v27 }
  0xfa   :  { %5581 = vmatprep.subr.bf16.mxu1 %v6746_v5 }
  0xfd   :  { %5582 = vmatpush3.bf16.msra.mxu1 %v6746_v5  ;;  %v6743_v5 = vld [vmem:[#allocation7 + $0x1c8] sm:$0xff]  }
  0xfe   :  { %5647 = vmatprep.subr.bf16.mxu1 %v7439_v30 }
  0xff   :  { %5520 = vmatmul.mubr.bf16.gmra.mrb[16].mxu1 %v7069_v23  ;;  %v3353_v23 = vrot.slane %v7413_v62, 6 }
 0x100   :  { %5872 = vmatmul.mubr.bf16.gmra.mrb[48].mxu0 %v7308_v54  ;;  %5523 = vmatprep.mubr.bf16.mxu1 %v7090_v43 }
 0x101   :  { %5875 = vmatprep.mubr.bf16.mxu0 %v7315_v60  ;;  %v3354_v43 = vsel %vm3351_vm2, %v3352_v11, %v3353_v23  ;;  %v3359_v11 = vrot.slane %v7425_v57, 6 }
 0x103   :  { %v3360_v47 = vsel %vm3351_vm2, %v3357_v33, %v3359_v11 }
 0x107   :  { %5524 = vmatmul.mubr.bf16.gmra.mrb[20].mxu1 %v7095_v49  ;;  %v3355_v49 = vrot.slane %v7417_v39, 6 }
 0x108   :  { %5876 = vmatmul.mubr.bf16.gmra.mrb[52].mxu0 %v7332_v14  ;;  %5527 = vmatprep.mubr.bf16.mxu1 %v7116_v9  ;;  %v3377_v9 = vrot.slane %v7151_v61, 6 }
 0x109   :  { %5879 = vmatprep.mubr.bf16.mxu0 %v7339_v32  ;;  %v3356_v12 = vsel %vm3351_vm2, %v3353_v23, %v3355_v49  ;;  %v3358_v27 = vsel %vm3351_vm2, %v3355_v49, %v3357_v33  ;;  %v6747_v49 = vld [vmem:[#allocation7 + $0x1d8] sm:$0xff]   ;;  %v6749_v33 = vld [vmem:[#allocation7 + $0x1e0] sm:$0xff]  }
 0x10f   :  { %5528 = vmatmul.mubr.bf16.gmra.mrb[24].mxu1 %v7123_v19 }
 0x110   :  { %5880 = vmatmul.mubr.bf16.gmra.mrb[56].mxu0 %v7359_v53  ;;  %5531 = vmatprep.mubr.bf16.mxu1 %v7151_v61  ;;  %v1352_v61 = vrot.slane %v7404_v46, 1 }
 0x111   :  { %5883 = vmatprep.mubr.bf16.mxu0 %v7366_v22 }
 0x117   :  { %5532 = vmatmul.mubr.bf16.gmra.mrb[28].mxu1 %v7155_v1 }
 0x118   :  { %5884 = vmatmul.mubr.bf16.gmra.mrb[60].mxu0 %v7385_v55  ;;  %5535 = vmatprep.mubr.bf16.mxu1 %v7180_v51 }
 0x119   :  { %5903 = vmatprep.mubr.bf16.mxu0 %v3354_v43  ;;  %v3361_v43 = vrot.slane %v7429_v45, 6 }
 0x11b   :  { %v3362_v23 = vsel %vm3351_vm2, %v3359_v11, %v3361_v43 }
 0x11f   :  { %5536 = vmatmul.mubr.bf16.gmra.mrb[32].mxu1 %v7186_v4 }
 0x120   :  { %5904 = vmatmul.mubr.bf16.vlgmr.msra.gmra.mrb[0].mxu0 %v3356_v12  ;;  %5539 = vmatprep.mubr.bf16.mxu1 %v7198_v7  ;;  %v7474_v12 = vld [vmem:[#allocation2 + $0x40] sm:$0xff]  }
 0x121   :  { %5968 = vmatpush3.bf16.msra.mxu0 %v7341_v13  ;;  %5907 = vmatprep.mubr.bf16.mxu0 %v3358_v27  ;;  %v3363_v13 = vrot.slane %v7433_v25, 6  ;;  %v3365_v27 = vrot.slane %v7474_v12, 6 }
 0x122   :  { %5969 = vmatprep.subr.bf16.mxu0 %v6743_v5 }
 0x123   :  { %v3366_v11 = vsel %vm3351_vm2, %v3363_v13, %v3365_v27 }
 0x125   :  { %5970 = vmatpush3.bf16.msra.mxu0 %v6743_v5  ;;  %v3364_v5 = vsel %vm3351_vm2, %v3361_v43, %v3363_v13 }
 0x126   :  { %5971 = vmatprep.subr.bf16.mxu0 %v6745_v63 }
 0x127   :  { %5540 = vmatmul.mubr.bf16.gmra.mrb[36].mxu1 %v7215_v24 }
 0x128   :  { %5908 = vmatmul.mubr.bf16.gmra.mrb[4].mxu0 %v3360_v47  ;;  %5543 = vmatprep.mubr.bf16.mxu1 %v7229_v28  ;;  %v7481_v47 = vld [vmem:[#allocation2 + $0x48] sm:$0xff]  }
 0x129   :  { %5911 = vmatprep.mubr.bf16.mxu0 %v3362_v23  ;;  %5972 = vmatpush3.bf16.msra.mxu0 %v6745_v63  ;;  %v3367_v63 = vrot.slane %v7481_v47, 6  ;;  %v7484_v23 = vld [vmem:[#allocation2 + $0x50] sm:$0xff]  }
 0x12a   :  { %5973 = vmatprep.subr.bf16.mxu0 %v6747_v49  ;;  %v3369_v43 = vrot.slane %v7484_v23, 6 }
 0x12b   :  { %v3368_v13 = vsel %vm3351_vm2, %v3365_v27, %v3367_v63  ;;  %v7495_v27 = vld [vmem:[#allocation7 + $0x200] sm:$0xff]  }
 0x12c   :  { %v3370_v16 = vsel %vm3351_vm2, %v3367_v63, %v3369_v43 }
 0x12d   :  { %5974 = vmatpush3.bf16.msra.mxu0 %v6747_v49  ;;  %v6753_v49 = vld [vmem:[#allocation7 + $0x1f0] sm:$0xff]  }
 0x12e   :  { %5975 = vmatprep.subr.bf16.mxu0 %v6749_v33 }
 0x12f   :  { %5544 = vmatmul.mubr.bf16.gmra.mrb[40].mxu1 %v7239_v15 }
 0x130   :  { %5912 = vmatmul.mubr.bf16.gmra.mrb[8].mxu0 %v3364_v5  ;;  %5547 = vmatprep.mubr.bf16.mxu1 %v7256_v52  ;;  %v6755_v5 = vld [vmem:[#allocation7 + $0x1f8] sm:$0xff]  }
 0x131   :  { %5915 = vmatprep.mubr.bf16.mxu0 %v3366_v11  ;;  %5976 = vmatpush3.bf16.msra.mxu0 %v6749_v33  ;;  %v7491_v33 = vld [vmem:[#allocation2 + $0x58] sm:$0xff]  }
 0x132   :  { %5977 = vmatprep.subr.bf16.mxu0 %v6751_v35  ;;  %v3371_v11 = vrot.slane %v7491_v33, 6 }
 0x134   :  { %v3374_v63 = vsel %vm3351_vm2, %v3371_v11, %v3373_v0 }
 0x135   :  { %5978 = vmatpush3.bf16.msra.mxu0 %v6751_v35  ;;  %v3372_v35 = vsel %vm3351_vm2, %v3369_v43, %v3371_v11  ;;  %v3379_v43 = vrot.slane %v7155_v1, 6  ;;  %v3385_v1 = vrot.slane %v7198_v7, 6 }
 0x136   :  { %5979 = vmatprep.subr.bf16.mxu0 %v6753_v49 }
 0x137   :  { %5548 = vmatmul.mubr.bf16.gmra.mrb[44].mxu1 %v7261_v20  ;;  %v3380_v11 = vsel %vm3351_vm2, %v3377_v9, %v3379_v43 }
 0x138   :  { %5916 = vmatmul.mubr.bf16.gmra.mrb[12].mxu0 %v3368_v13  ;;  %5551 = vmatprep.mubr.bf16.mxu1 %v7284_v26 }
 0x139   :  { %5919 = vmatprep.mubr.bf16.mxu0 %v3370_v16  ;;  %5980 = vmatpush3.bf16.msra.mxu0 %v6753_v49  ;;  %v3375_v16 = vrot.slane %v7123_v19, 6 }
 0x13a   :  { %5981 = vmatprep.subr.bf16.mxu0 %v6755_v5 }
 0x13b   :  { %v3376_v49 = vsel %vm3351_vm2, %v3373_v0, %v3375_v16  ;;  %v3378_v13 = vsel %vm3351_vm2, %v3375_v16, %v3377_v9  ;;  %v3383_v0 = vrot.slane %v7186_v4, 6  ;;  %v1355_v9 = vrot.slane %v7413_v62, 1 }
 0x13c   :  { %v3387_v4 = vrot.slane %v7215_v24, 6  ;;  %v3391_v24 = vrot.slane %v7239_v15, 6 }
 0x13d   :  { %5982 = vmatpush3.bf16.msra.mxu0 %v6755_v5  ;;  %v3381_v5 = vrot.slane %v7180_v51, 6  ;;  %v3386_v16 = vsel %vm3351_vm2, %v3383_v0, %v3385_v1 }
 0x13e   :  { %6047 = vmatprep.subr.bf16.mxu0 %v7495_v27 }
 0x13f   :  { %5552 = vmatmul.mubr.bf16.gmra.mrb[48].mxu1 %v7289_v41  ;;  %v3382_v19 = vsel %vm3351_vm2, %v3379_v43, %v3381_v5  ;;  %v3384_v51 = vsel %vm3351_vm2, %v3381_v5, %v3383_v0  ;;  %v3388_v43 = vsel %vm3351_vm2, %v3385_v1, %v3387_v4  ;;  %v1359_v0 = vrot.slane %v7421_v59, 1 }
 0x140   :  { %5920 = vmatmul.mubr.bf16.gmra.mrb[16].mxu0 %v3372_v35  ;;  %5555 = vmatprep.mubr.bf16.mxu1 %v7308_v54  ;;  %v1353_v35 = vrot.slane %v7408_v38, 1  ;;  %v3393_v1 = vrot.slane %v7256_v52, 6 }
 0x141   :  { %5923 = vmatprep.mubr.bf16.mxu0 %v3374_v63 }
 0x142   :  { %v1354_v63 = vsel %vm1351_vm3, %v1352_v61, %v1353_v35  ;;  %v1356_v7 = vsel %vm1351_vm3, %v1353_v35, %v1355_v9  ;;  %v1361_v61 = vrot.slane %v7425_v57, 1  ;;  %v6752_v35 = vld [vmem:[#allocation7 + $0xd0] sm:$0xff]  }
 0x147   :  { %5556 = vmatmul.mubr.bf16.gmra.mrb[52].mxu1 %v7315_v60 }
 0x148   :  { %5924 = vmatmul.mubr.bf16.gmra.mrb[20].mxu0 %v3376_v49  ;;  %5559 = vmatprep.mubr.bf16.mxu1 %v7332_v14  ;;  %v1357_v49 = vrot.slane %v7417_v39, 1 }
 0x149   :  { %5927 = vmatprep.mubr.bf16.mxu0 %v3378_v13  ;;  %v3389_v13 = vrot.slane %v7229_v28, 6 }
 0x14a   :  { %v1358_v5 = vsel %vm1351_vm3, %v1355_v9, %v1357_v49  ;;  %v6754_v9 = vld [vmem:[#allocation7 + $0xd8] sm:$0xff]  }
 0x14f   :  { %5560 = vmatmul.mubr.bf16.gmra.mrb[56].mxu1 %v7339_v32 }
 0x150   :  { %5928 = vmatmul.mubr.bf16.gmra.mrb[24].mxu0 %v3380_v11  ;;  %5563 = vmatprep.mubr.bf16.mxu1 %v7359_v53  ;;  %v3390_v11 = vsel %vm3351_vm2, %v3387_v4, %v3389_v13  ;;  %v1363_v4 = vrot.slane %v7429_v45, 1 }
 0x151   :  { %5931 = vmatprep.mubr.bf16.mxu0 %v3382_v19  ;;  %v6750_v19 = vld [vmem:[#allocation7 + $0xc8] sm:$0xff]  }
 0x157   :  { %5564 = vmatmul.mubr.bf16.gmra.mrb[60].mxu1 %v7366_v22 }
 0x158   :  { %5932 = vmatmul.mubr.bf16.gmra.mrb[28].mxu0 %v3384_v51  ;;  %5583 = vmatprep.mubr.bf16.mxu1 %v1354_v63  ;;  %v1360_v51 = vsel %vm1351_vm3, %v1357_v49, %v1359_v0  ;;  %v3392_v63 = vsel %vm3351_vm2, %v3389_v13, %v3391_v24  ;;  %v3397_v49 = vrot.slane %v7284_v26, 6  ;;  %v6757_v13 = vld [vmem:[#allocation7 + $0xe0] sm:$0xff]  }
 0x159   :  { %5935 = vmatprep.mubr.bf16.mxu0 %v3386_v16  ;;  %v1362_v16 = vsel %vm1351_vm3, %v1359_v0, %v1361_v61 }
 0x15f   :  { %5584 = vmatmul.mubr.bf16.vlgmr.msra.gmra.mrb[0].mxu1 %v1356_v7  ;;  %v3395_v7 = vrot.slane %v7261_v20, 6 }
 0x160   :  { %5936 = vmatmul.mubr.bf16.gmra.mrb[32].mxu0 %v3388_v43  ;;  %5648 = vmatpush3.bf16.msra.mxu1 %v7439_v30  ;;  %v3394_v30 = vsel %vm3351_vm2, %v3391_v24, %v3393_v1  ;;  %v1365_v43 = vrot.slane %v7433_v25, 1  ;;  %v6759_v24 = vld [vmem:[#allocation7 + $0xe8] sm:$0xff]  }
 0x161   :  { %5587 = vmatprep.mubr.bf16.mxu1 %v1358_v5  ;;  %5939 = vmatprep.mubr.bf16.mxu0 %v3390_v11  ;;  %v1364_v5 = vsel %vm1351_vm3, %v1361_v61, %v1363_v4  ;;  %v3396_v11 = vsel %vm3351_vm2, %v3393_v1, %v3395_v7  ;;  %v3398_v0 = vsel %vm3351_vm2, %v3395_v7, %v3397_v49  ;;  %v3401_v61 = vrot.slane %v7308_v54, 6  ;;  %v6761_v1 = vld [vmem:[#allocation7 + $0xf0] sm:$0xff]   ;;  %v6763_v7 = vld [vmem:[#allocation7 + $0xf8] sm:$0xff]  }
 0x162   :  { %5649 = vmatprep.subr.bf16.mxu1 %v6750_v19 }
 0x164   :  { %5650 = vmatpush3.bf16.msra.mxu1 %v6750_v19  ;;  %v1366_v19 = vsel %vm1351_vm3, %v1363_v4, %v1365_v43 }
 0x165   :  { %5651 = vmatprep.subr.bf16.mxu1 %v6752_v35 }
 0x167   :  { %5588 = vmatmul.mubr.bf16.gmra.mrb[4].mxu1 %v1360_v51  ;;  %v3399_v51 = vrot.slane %v7289_v41, 6 }
 0x168   :  { %5940 = vmatmul.mubr.bf16.gmra.mrb[36].mxu0 %v3392_v63  ;;  %5591 = vmatprep.mubr.bf16.mxu1 %v1362_v16  ;;  %v1369_v63 = vrot.slane %v7481_v47, 1 }
 0x169   :  { %5943 = vmatprep.mubr.bf16.mxu0 %v3394_v30  ;;  %5652 = vmatpush3.bf16.msra.mxu1 %v6752_v35  ;;  %v1367_v35 = vrot.slane %v7474_v12, 1  ;;  %v3400_v30 = vsel %vm3351_vm2, %v3397_v49, %v3399_v51  ;;  %v3402_v4 = vsel %vm3351_vm2, %v3399_v51, %v3401_v61  ;;  %v7566_v51 = vld [vmem:[#allocation2 + $0x60] sm:$0xff]  }
 0x16a   :  { %5653 = vmatprep.subr.bf16.mxu1 %v6754_v9 }
 0x16b   :  { %v1368_v16 = vsel %vm1351_vm3, %v1365_v43, %v1367_v35  ;;  %v3405_v43 = vrot.slane %v7332_v14, 6 }
 0x16d   :  { %5654 = vmatpush3.bf16.msra.mxu1 %v6754_v9  ;;  %v1370_v9 = vsel %vm1351_vm3, %v1367_v35, %v1369_v63  ;;  %v7563_v35 = vld [vmem:[#allocation7 + $0x100] sm:$0xff]  }
 0x16e   :  { %5655 = vmatprep.subr.bf16.mxu1 %v6757_v13 }
 0x16f   :  { %5592 = vmatmul.mubr.bf16.gmra.mrb[8].mxu1 %v1364_v5  ;;  %v3403_v5 = vrot.slane %v7315_v60, 6 }
 0x170   :  { %5944 = vmatmul.mubr.bf16.gmra.mrb[40].mxu0 %v3396_v11  ;;  %5595 = vmatprep.mubr.bf16.mxu1 %v1366_v19  ;;  %v1373_v11 = vrot.slane %v7491_v33, 1 }
 0x171   :  { %5947 = vmatprep.mubr.bf16.mxu0 %v3398_v0  ;;  %5656 = vmatpush3.bf16.msra.mxu1 %v6757_v13  ;;  %v1371_v13 = vrot.slane %v7484_v23, 1  ;;  %v3404_v19 = vsel %vm3351_vm2, %v3401_v61, %v3403_v5  ;;  %v7570_v61 = vld [vmem:[#allocation2 + $0x68] sm:$0xff]  }
 0x172   :  { %5657 = vmatprep.subr.bf16.mxu1 %v6759_v24  ;;  %8164 = vst [vmem:[#allocation55_spill] sm:$0xff] %v7570_v61 }
 0x173   :  { %v1372_v49 = vsel %vm1351_vm3, %v1369_v63, %v1371_v13  ;;  %v1374_v0 = vsel %vm1351_vm3, %v1371_v13, %v1373_v11  ;;  %v3407_v63 = vrot.slane %v7339_v32, 6 }
 0x175   :  { %5658 = vmatpush3.bf16.msra.mxu1 %v6759_v24  ;;  %v3406_v24 = vsel %vm3351_vm2, %v3403_v5, %v3405_v43  ;;  %v7578_v5 = vld [vmem:[#allocation2 + $0x70] sm:$0xff]  }
 0x176   :  { %5659 = vmatprep.subr.bf16.mxu1 %v6761_v1  ;;  %8165 = vst [vmem:[#allocation56_spill] sm:$0xff] %v7578_v5 }
 0x177   :  { %5596 = vmatmul.mubr.bf16.gmra.mrb[12].mxu1 %v1368_v16  ;;  %v1377_v16 = vrot.slane %v7570_v61, 1 }
 0x178   :  { %5948 = vmatmul.mubr.bf16.gmra.mrb[44].mxu0 %v3400_v30  ;;  %5599 = vmatprep.mubr.bf16.mxu1 %v1370_v9  ;;  %v3409_v30 = vrot.slane %v7359_v53, 6 }
 0x179   :  { %5951 = vmatprep.mubr.bf16.mxu0 %v3402_v4  ;;  %5660 = vmatpush3.bf16.msra.mxu1 %v6761_v1  ;;  %v1375_v1 = vrot.slane %v7566_v51, 1  ;;  %v3408_v4 = vsel %vm3351_vm2, %v3405_v43, %v3407_v63  ;;  %v3413_v43 = vrot.slane %v7385_v55, 6 }
 0x17a   :  { %5661 = vmatprep.subr.bf16.mxu1 %v6763_v7  ;;  %v3410_v13 = vsel %vm3351_vm2, %v3407_v63, %v3409_v30 }
 0x17b   :  { %v1376_v9 = vsel %vm1351_vm3, %v1373_v11, %v1375_v1 }
 0x17d   :  { %5662 = vmatpush3.bf16.msra.mxu1 %v6763_v7  ;;  %v1378_v7 = vsel %vm1351_vm3, %v1375_v1, %v1377_v16 }
 0x17e   :  { %6127 = vmatprep.subr.bf16.mxu1 %v7563_v35 }
 0x17f   :  { %5600 = vmatmul.mubr.bf16.gmra.mrb[16].mxu1 %v1372_v49  ;;  %v1379_v49 = vrot.slane %v7578_v5, 1  ;;  %v3871_v5 = vrot.slane %v6991_v21, 6 }
 0x180   :  { %5952 = vmatmul.mubr.bf16.gmra.mrb[48].mxu0 %v3404_v19  ;;  %5603 = vmatprep.mubr.bf16.mxu1 %v1374_v0  ;;  %v3411_v19 = vrot.slane %v7366_v22, 6  ;;  %v7582_v0 = vld [vmem:[#allocation2 + $0x78] sm:$0xff]  }
 0x181   :  { %5955 = vmatprep.mubr.bf16.mxu0 %v3406_v24  ;;  %8166 = vst [vmem:[#allocation57_spill] sm:$0xff] %v7582_v0  ;;  %v1381_v11 = vrot.slane %v7582_v0, 1  ;;  %v1380_v24 = vsel %vm1351_vm3, %v1377_v16, %v1379_v49  ;;  %v3872_v0 = vrot.slane %v6997_v29, 7  ;;  %v7596_v16 = vld [vmem:[#allocation2 + $0x80] sm:$0xff]  }
 0x182   :  { %v3412_v1 = vsel %vm3351_vm2, %v3409_v30, %v3411_v19  ;;  %8168 = vst [vmem:[#allocation59_spill] sm:$0xff] %v7596_v16  ;;  %v1383_v30 = vrot.slane %v7596_v16, 1  ;;  %v3879_v16 = vrot.slane %v7019_v44, 6 }
 0x183   :  { %v1382_v63 = vsel %vm1351_vm3, %v1379_v49, %v1381_v11 }
 0x184   :  { %v1384_v21 = vsel %vm1351_vm3, %v1381_v11, %v1383_v30 }
 0x187   :  { %5604 = vmatmul.mubr.bf16.gmra.mrb[20].mxu1 %v1376_v9  ;;  %v3414_v9 = vsel %vm3351_vm2, %v3411_v19, %v3413_v43  ;;  %v7600_v19 = vld [vmem:[#allocation2 + $0x88] sm:$0xff]  }
 0x188   :  { %5956 = vmatmul.mubr.bf16.gmra.mrb[52].mxu0 %v3408_v4  ;;  %5607 = vmatprep.mubr.bf16.mxu1 %v1378_v7  ;;  %v7590_v4 = vld [vmem:[#allocation5 + $0x8] sm:$0xff]   ;;  %v3868_v7 = vrot.slane %v6988_v18, 6  ;;  %v1385_v18 = vrot.slane %v7600_v19, 1 }
 0x189   :  { %5959 = vmatprep.mubr.bf16.mxu0 %v3410_v13  ;;  %8167 = vst [vmem:[#allocation58_spill] sm:$0xff] %v7590_v4  ;;  %v3869_v13 = vrot.slane %v6985_v17, 7  ;;  %v3415_v49 = vrot.slane %v7590_v4, 6  ;;  %v3873_v17 = vor.u32 %v3872_v0, %v3871_v5  ;;  %v3880_v4 = vrot.slane %v7028_v50, 7  ;;  %v7611_v5 = vld [vmem:[#allocation2 + $0x90] sm:$0xff]  }
 0x18a   :  { %v1387_v0 = vrot.slane %v7611_v5, 1 }
 0x18b   :  { %v3870_v61 = vor.u32 %v3869_v13, %v3868_v7  ;;  %v3416_v29 = vsel %vm3351_vm2, %v3413_v43, %v3415_v49  ;;  %v7614_v43 = vld [vmem:[#allocation2 + $0x98] sm:$0xff]   ;;  %v3883_v7 = vrot.slane %v7024_v48, 6  ;;  %v3884_v13 = vrot.slane %v7036_v56, 7  ;;  %v6762_v56 = vld [vmem:[#allocation7 + $0x210] sm:$0xff]  }
 0x18c   :  { %v3887_v49 = vrot.slane %v7049_v3, 6  ;;  %v1393_v48 = vrot.slane %v7239_v15, 1  ;;  %v3896_v15 = vrot.slane %v7084_v40, 7 }
 0x18f   :  { %5608 = vmatmul.mubr.bf16.gmra.mrb[24].mxu1 %v1380_v24  ;;  %v1386_v24 = vsel %vm1351_vm3, %v1383_v30, %v1385_v18 }
 0x190   :  { %5960 = vmatmul.mubr.bf16.gmra.mrb[56].mxu0 %v3412_v1  ;;  %5611 = vmatprep.mubr.bf16.mxu1 %v1382_v63  ;;  %v3875_v1 = vrot.slane %v7010_v37, 6  ;;  %v3876_v63 = vrot.slane %v7007_v36, 7  ;;  %v1389_v37 = vrot.slane %v7614_v43, 1  ;;  %v3881_v36 = vor.u32 %v3880_v4, %v3879_v16 }
 0x191   :  { %5963 = vmatprep.mubr.bf16.mxu0 %v3414_v9  ;;  %v3874_v9 = vsel %vm3867_vm4, %v3870_v61, %v3873_v17  ;;  %v1388_v61 = vsel %vm1351_vm3, %v1385_v18, %v1387_v0  ;;  %v1391_v4 = vrot.slane %v7229_v28, 1  ;;  %v3885_v16 = vor.u32 %v3884_v13, %v3883_v7 }
 0x192   :  { %v3877_v11 = vor.u32 %v3876_v63, %v3875_v1  ;;  %v1390_v50 = vsel %vm1351_vm3, %v1387_v0, %v1389_v37  ;;  %v3892_v1 = vrot.slane %v7060_v10, 7  ;;  %v6764_v63 = vld [vmem:[#allocation7 + $0x218] sm:$0xff]   ;;  %v1399_v7 = vrot.slane %v7284_v26, 1 }
 0x193   :  { %v3886_v3 = vsel %vm3867_vm4, %v3881_v36, %v3885_v16 }
 0x194   :  { %v3878_v44 = vsel %vm3867_vm4, %v3873_v17, %v3877_v11  ;;  %v3882_v30 = vsel %vm3867_vm4, %v3877_v11, %v3881_v36  ;;  %v1392_v17 = vsel %vm1351_vm3, %v1389_v37, %v1391_v4  ;;  %v6765_v11 = vld [vmem:[#allocation7 + $0x220] sm:$0xff]   ;;  %v3899_v36 = vrot.slane %v7081_v34, 6 }
 0x195   :  { %v1401_v34 = vrot.slane %v7289_v41, 1  ;;  %v8172_v41 = vld [vmem:[#allocation16_spill] sm:$0xff] }
 0x197   :  { %5612 = vmatmul.mubr.bf16.gmra.mrb[28].mxu1 %v1384_v21  ;;  %v3888_v21 = vrot.slane %v7056_v8, 7  ;;  %v1394_v8 = vsel %vm1351_vm3, %v1391_v4, %v1393_v48  ;;  %v8170_v4 = vld [vmem:[#allocation13_spill] sm:$0xff] }
 0x198   :  { %5964 = vmatmul.mubr.bf16.gmra.mrb[60].mxu0 %v3416_v29  ;;  %5615 = vmatprep.mubr.bf16.mxu1 %v1386_v24  ;;  %v6760_v29 = vld [vmem:[#allocation7 + $0x208] sm:$0xff]   ;;  %v3891_v24 = vrot.slane %v7053_v6, 6  ;;  %v1397_v6 = vrot.slane %v7261_v20, 1  ;;  %v3904_v20 = vrot.slane %v7112_v2, 7  ;;  %v1402_v2 = vsel %vm1351_vm3, %v1399_v7, %v1401_v34 }
 0x199   :  { %5983 = vmatprep.mubr.bf16.mxu0 %v3874_v9  ;;  %v3889_v18 = vor.u32 %v3888_v21, %v3887_v49  ;;  %v1395_v9 = vrot.slane %v7256_v52, 1  ;;  %v8169_v21 = vld [vmem:[#allocation12_spill] sm:$0xff] }
 0x19a   :  { %v3893_v0 = vor.u32 %v3892_v1, %v3891_v24  ;;  %v1400_v49 = vsel %vm1351_vm3, %v1397_v6, %v1399_v7  ;;  %v1405_v24 = vrot.slane %v7315_v60, 1 }
 0x19b   :  { %v3890_v28 = vsel %vm3867_vm4, %v3885_v16, %v3889_v18  ;;  %v1396_v37 = vsel %vm1351_vm3, %v1393_v48, %v1395_v9  ;;  %v1398_v40 = vsel %vm1351_vm3, %v1395_v9, %v1397_v6  ;;  %v3908_v16 = vrot.slane %v8170_v4, 7  ;;  %v8171_v48 = vld [vmem:[#allocation14_spill] sm:$0xff] }
 0x19f   :  { %5616 = vmatmul.mubr.bf16.gmra.mrb[32].mxu1 %v1388_v61  ;;  %v3900_v61 = vrot.slane %v7088_v42, 7 }
 0x1a0   :  { %5984 = vmatmul.mubr.bf16.vlgmr.msra.gmra.mrb[0].mxu0 %v3878_v44  ;;  %5619 = vmatprep.mubr.bf16.mxu1 %v1390_v50  ;;  %v3903_v44 = vrot.slane %v7102_v58, 6  ;;  %v6766_v50 = vld [vmem:[#allocation7 + $0x228] sm:$0xff]  }
 0x1a1   :  { %6048 = vmatpush3.bf16.msra.mxu0 %v7495_v27  ;;  %5987 = vmatprep.mubr.bf16.mxu0 %v3882_v30  ;;  %v3895_v27 = vrot.slane %v7077_v31, 6  ;;  %v3894_v31 = vsel %vm3867_vm4, %v3889_v18, %v3893_v0  ;;  %v3901_v13 = vor.u32 %v3900_v61, %v3899_v36  ;;  %v6767_v30 = vld [vmem:[#allocation7 + $0x230] sm:$0xff]   ;;  %v3911_v18 = vrot.slane %v8171_v48, 6 }
 0x1a2   :  { %6049 = vmatprep.subr.bf16.mxu0 %v6760_v29  ;;  %v3905_v42 = vor.u32 %v3904_v20, %v3903_v44  ;;  %v1409_v36 = vrot.slane %v7339_v32, 1  ;;  %v1411_v32 = vrot.slane %v7359_v53, 1  ;;  %v8181_v48 = vld [vmem:[#allocation26_spill] sm:$0xff]  ;;  %v8184_v53 = vld [vmem:[#allocation25_spill] sm:$0xff] }
 0x1a3   :  { %v3897_v10 = vor.u32 %v3896_v15, %v3895_v27 }
 0x1a4   :  { %v3906_v26 = vsel %vm3867_vm4, %v3901_v13, %v3905_v42  ;;  %v1412_v4 = vsel %vm1351_vm3, %v1409_v36, %v1411_v32 }
 0x1a5   :  { %6050 = vmatpush3.bf16.msra.mxu0 %v6760_v29  ;;  %v3898_v52 = vsel %vm3867_vm4, %v3893_v0, %v3897_v10  ;;  %v3902_v58 = vsel %vm3867_vm4, %v3897_v10, %v3901_v13  ;;  %v3907_v29 = vrot.slane %v8169_v21, 6  ;;  %v8174_v0 = vld [vmem:[#allocation17_spill] sm:$0xff]  ;;  %v8175_v10 = vld [vmem:[#allocation18_spill] sm:$0xff]  ;;  %v1413_v21 = vrot.slane %v7366_v22, 1 }
 0x1a6   :  { %6051 = vmatprep.subr.bf16.mxu0 %v6762_v56  ;;  %v3916_v6 = vrot.slane %v8174_v0, 7  ;;  %v8178_v13 = vld [vmem:[#allocation21_spill] sm:$0xff]  ;;  %v1415_v22 = vrot.slane %v7385_v55, 1 }
 0x1a7   :  { %5620 = vmatmul.mubr.bf16.gmra.mrb[36].mxu1 %v1392_v17  ;;  %v6768_v17 = vld [vmem:[#allocation7 + $0x238] sm:$0xff]  }
 0x1a8   :  { %5988 = vmatmul.mubr.bf16.gmra.mrb[4].mxu0 %v3886_v3  ;;  %5623 = vmatprep.mubr.bf16.mxu1 %v1394_v8  ;;  %v1403_v3 = vrot.slane %v7308_v54, 1  ;;  %v3909_v8 = vor.u32 %v3908_v16, %v3907_v29 }
 0x1a9   :  { %5991 = vmatprep.mubr.bf16.mxu0 %v3890_v28  ;;  %6052 = vmatpush3.bf16.msra.mxu0 %v6762_v56  ;;  %v3912_v56 = vrot.slane %v8172_v41, 7  ;;  %v8182_v41 = vld [vmem:[#allocation24_spill] sm:$0xff] }
 0x1aa   :  { %6053 = vmatprep.subr.bf16.mxu0 %v6764_v63  ;;  %v1404_v28 = vsel %vm1351_vm3, %v1401_v34, %v1403_v3  ;;  %v3910_v27 = vsel %vm3867_vm4, %v3905_v42, %v3909_v8  ;;  %v1406_v15 = vsel %vm1351_vm3, %v1403_v3, %v1405_v24  ;;  %v3924_v34 = vrot.slane %v8178_v13, 7  ;;  %v8183_v3 = vld [vmem:[#allocation27_spill] sm:$0xff] }
 0x1ab   :  { %v3913_v1 = vor.u32 %v3912_v56, %v3911_v18  ;;  %v3931_v18 = vrot.slane %v8181_v48, 6  ;;  %v3932_v56 = vrot.slane %v8182_v41, 7 }
 0x1ad   :  { %6054 = vmatpush3.bf16.msra.mxu0 %v6764_v63  ;;  %v8173_v63 = vld [vmem:[#allocation15_spill] sm:$0xff]  ;;  %v3914_v54 = vsel %vm3867_vm4, %v3909_v8, %v3913_v1  ;;  %v3935_v8 = vrot.slane %v8183_v3, 6 }
 0x1ae   :  { %6055 = vmatprep.subr.bf16.mxu0 %v6765_v11  ;;  %v3915_v9 = vrot.slane %v8173_v63, 6  ;;  %v1416_v63 = vsel %vm1351_vm3, %v1413_v21, %v1415_v22  ;;  %v8196_v22 = vld [vmem:[#allocation37_spill] sm:$0xff] }
 0x1af   :  { %5624 = vmatmul.mubr.bf16.gmra.mrb[40].mxu1 %v1396_v37  ;;  %v8176_v37 = vld [vmem:[#allocation20_spill] sm:$0xff] }
 0x1b0   :  { %5992 = vmatmul.mubr.bf16.gmra.mrb[8].mxu0 %v3894_v31  ;;  %5627 = vmatprep.mubr.bf16.mxu1 %v1398_v40  ;;  %v3920_v60 = vrot.slane %v8176_v37, 7  ;;  %v1407_v31 = vrot.slane %v7332_v14, 1  ;;  %v3917_v40 = vor.u32 %v3916_v6, %v3915_v9  ;;  %v8180_v14 = vld [vmem:[#allocation23_spill] sm:$0xff]  ;;  %v8185_v6 = vld [vmem:[#allocation29_spill] sm:$0xff] }
 0x1b1   :  { %5995 = vmatprep.mubr.bf16.mxu0 %v3898_v52  ;;  %6056 = vmatpush3.bf16.msra.mxu0 %v6765_v11  ;;  %v3919_v11 = vrot.slane %v8175_v10, 6  ;;  %v8186_v10 = vld [vmem:[#allocation28_spill] sm:$0xff]  ;;  %v8187_v37 = vld [vmem:[#allocation31_spill] sm:$0xff] }
 0x1b2   :  { %6057 = vmatprep.subr.bf16.mxu0 %v6766_v50  ;;  %v1408_v52 = vsel %vm1351_vm3, %v1405_v24, %v1407_v31  ;;  %v3918_v44 = vsel %vm3867_vm4, %v3913_v1, %v3917_v40  ;;  %v1410_v20 = vsel %vm1351_vm3, %v1407_v31, %v1409_v36  ;;  %v3936_v24 = vrot.slane %v8184_v53, 7  ;;  %v8188_v31 = vld [vmem:[#allocation30_spill] sm:$0xff] }
 0x1b3   :  { %v3921_v61 = vor.u32 %v3920_v60, %v3919_v11  ;;  %v3933_v1 = vor.u32 %v3932_v56, %v3931_v18  ;;  %v3940_v11 = vrot.slane %v8186_v10, 7  ;;  %v3943_v60 = vrot.slane %v8187_v37, 6  ;;  %v8194_v18 = vld [vmem:[#allocation36_spill] sm:$0xff] }
 0x1b4   :  { %v1873_v36 = vrot.slane %v7417_v39, 7  ;;  %v1875_v39 = vrot.slane %v7421_v59, 7  ;;  %v3956_v56 = vrot.slane %v8194_v18, 7 }
 0x1b5   :  { %6058 = vmatpush3.bf16.msra.mxu0 %v6766_v50  ;;  %v8177_v50 = vld [vmem:[#allocation19_spill] sm:$0xff]  ;;  %v3922_v42 = vsel %vm3867_vm4, %v3917_v40, %v3921_v61 }
 0x1b6   :  { %6059 = vmatprep.subr.bf16.mxu0 %v6767_v30  ;;  %v3923_v7 = vrot.slane %v8177_v50, 6 }
 0x1b7   :  { %5628 = vmatmul.mubr.bf16.gmra.mrb[44].mxu1 %v1400_v49 }
 0x1b8   :  { %5996 = vmatmul.mubr.bf16.gmra.mrb[12].mxu0 %v3902_v58  ;;  %5631 = vmatprep.mubr.bf16.mxu1 %v1402_v2  ;;  %v3928_v58 = vrot.slane %v8180_v14, 7  ;;  %v3925_v2 = vor.u32 %v3924_v34, %v3923_v7  ;;  %v8190_v7 = vld [vmem:[#allocation32_spill] sm:$0xff]  ;;  %v8192_v14 = vld [vmem:[#allocation34_spill] sm:$0xff] }
 0x1b9   :  { %5999 = vmatprep.mubr.bf16.mxu0 %v3906_v26  ;;  %6060 = vmatpush3.bf16.msra.mxu0 %v6767_v30  ;;  %v8179_v30 = vld [vmem:[#allocation22_spill] sm:$0xff]  ;;  %v1414_v26 = vsel %vm1351_vm3, %v1411_v32, %v1413_v21  ;;  %v3948_v13 = vrot.slane %v8190_v7, 7 }
 0x1ba   :  { %6061 = vmatprep.subr.bf16.mxu0 %v6768_v17  ;;  %v3927_v49 = vrot.slane %v8179_v30, 6  ;;  %v3926_v16 = vsel %vm3867_vm4, %v3921_v61, %v3925_v2 }
 0x1bc   :  { %v3929_v29 = vor.u32 %v3928_v58, %v3927_v49  ;;  %v3952_v58 = vrot.slane %v8192_v14, 7 }
 0x1bd   :  { %6062 = vmatpush3.bf16.msra.mxu0 %v6768_v17 }
 0x1be   :  { %v3930_v17 = vsel %vm3867_vm4, %v3925_v2, %v3929_v29  ;;  %v3934_v9 = vsel %vm3867_vm4, %v3929_v29, %v3933_v1  ;;  %v1877_v2 = vrot.slane %v7425_v57, 7  ;;  %v6790_v29 = vld [vmem:[#allocation7 + $0x108] sm:$0xff]  }
 0x1bf   :  { %5632 = vmatmul.mubr.bf16.gmra.mrb[48].mxu1 %v1404_v28  ;;  %v1868_v28 = vrot.slane %v7404_v46, 7  ;;  %v3944_v46 = vrot.slane %v8188_v31, 7 }
 0x1c0   :  { %6000 = vmatmul.mubr.bf16.gmra.mrb[16].mxu0 %v3910_v27  ;;  %5635 = vmatprep.mubr.bf16.mxu1 %v1406_v15  ;;  %v1869_v27 = vrot.slane %v7408_v38, 7  ;;  %v3937_v15 = vor.u32 %v3936_v24, %v3935_v8  ;;  %v1871_v38 = vrot.slane %v7413_v62, 7  ;;  %v8191_v62 = vld [vmem:[#allocation35_spill] sm:$0xff] }
 0x1c1   :  { %6003 = vmatprep.mubr.bf16.mxu0 %v3914_v54  ;;  %v3939_v54 = vrot.slane %v8185_v6, 6  ;;  %v3945_v61 = vor.u32 %v3944_v46, %v3943_v60  ;;  %v3951_v49 = vrot.slane %v8191_v62, 6  ;;  %v8195_v8 = vld [vmem:[#allocation39_spill] sm:$0xff]  ;;  %v8198_v46 = vld [vmem:[#allocation40_spill] sm:$0xff] }
 0x1c2   :  { %v1870_v0 = vsel %vm1867_vm5, %v1868_v28, %v1869_v27  ;;  %v3938_v55 = vsel %vm3867_vm4, %v3933_v1, %v3937_v15  ;;  %v7706_v34 = vsel %vm1867_vm5, %v1871_v38, %v1873_v36  ;;  %v3959_v24 = vrot.slane %v8195_v8, 6 }
 0x1c3   :  { %v3941_v40 = vor.u32 %v3940_v11, %v3939_v54  ;;  %v3953_v21 = vor.u32 %v3952_v58, %v3951_v49  ;;  %v3960_v1 = vrot.slane %v8196_v22, 7  ;;  %v1879_v28 = vrot.slane %v7429_v45, 7  ;;  %v6794_v58 = vld [vmem:[#allocation7 + $0x128] sm:$0xff]  }
 0x1c4   :  { %v3964_v45 = vrot.slane %v8198_v46, 7 }
 0x1c7   :  { %5636 = vmatmul.mubr.bf16.gmra.mrb[52].mxu1 %v1408_v52  ;;  %v7700_v52 = vsel %vm1867_vm5, %v1869_v27, %v1871_v38 }
 0x1c8   :  { %6004 = vmatmul.mubr.bf16.gmra.mrb[20].mxu0 %v3918_v44  ;;  %5639 = vmatprep.mubr.bf16.mxu1 %v1410_v20  ;;  %v3942_v44 = vsel %vm3867_vm4, %v3937_v15, %v3941_v40  ;;  %v8189_v20 = vld [vmem:[#allocation33_spill] sm:$0xff]  ;;  %v1881_v15 = vrot.slane %v7433_v25, 7  ;;  %v8199_v25 = vld [vmem:[#allocation43_spill] sm:$0xff] }
 0x1c9   :  { %6007 = vmatprep.mubr.bf16.mxu0 %v3922_v42  ;;  %v3947_v50 = vrot.slane %v8189_v20, 6  ;;  %v3946_v42 = vsel %vm3867_vm4, %v3941_v40, %v3945_v61  ;;  %v3967_v40 = vrot.slane %v8199_v25, 6 }
 0x1ca   :  { %v7737_v11 = vsel %vm1867_vm5, %v1879_v28, %v1881_v15 }
 0x1cb   :  { %v3949_v32 = vor.u32 %v3948_v13, %v3947_v50  ;;  %v1883_v50 = vrot.slane %v7474_v12, 7 }
 0x1cd   :  { %v3954_v57 = vsel %vm3867_vm4, %v3949_v32, %v3953_v21 }
 0x1cf   :  { %5640 = vmatmul.mubr.bf16.gmra.mrb[56].mxu1 %v1412_v4  ;;  %v7717_v4 = vsel %vm1867_vm5, %v1873_v36, %v1875_v39  ;;  %v8200_v36 = vld [vmem:[#allocation41_spill] sm:$0xff] }
 0x1d0   :  { %6008 = vmatmul.mubr.bf16.gmra.mrb[24].mxu0 %v3926_v16  ;;  %5643 = vmatprep.mubr.bf16.mxu1 %v1414_v26  ;;  %v3950_v16 = vsel %vm3867_vm4, %v3945_v61, %v3949_v32  ;;  %v7721_v26 = vsel %vm1867_vm5, %v1875_v39, %v1877_v2  ;;  %v3968_v61 = vrot.slane %v8200_v36, 7  ;;  %v7749_v39 = vsel %vm1867_vm5, %v1881_v15, %v1883_v50 }
 0x1d1   :  { %6011 = vmatprep.mubr.bf16.mxu0 %v3930_v17  ;;  %v6791_v17 = vld [vmem:[#allocation7 + $0x110] sm:$0xff]  }
 0x1d2   :  { %v3969_v49 = vor.u32 %v3968_v61, %v3967_v40  ;;  %v8206_v40 = vld [vmem:[#allocation48_spill] sm:$0xff] }
 0x1d7   :  { %5644 = vmatmul.mubr.bf16.gmra.mrb[60].mxu1 %v1416_v63  ;;  %v3961_v63 = vor.u32 %v3960_v1, %v3959_v24  ;;  %v6795_v24 = vld [vmem:[#allocation7 + $0x130] sm:$0xff]   ;;  %v1887_v1 = vrot.slane %v7484_v23, 7  ;;  %v3980_v23 = vrot.slane %v8206_v40, 7 }
 0x1d8   :  { %6012 = vmatmul.mubr.bf16.gmra.mrb[28].mxu0 %v3934_v9  ;;  %5663 = vmatprep.mubr.bf16.mxu1 %v1870_v0  ;;  %v6792_v9 = vld [vmem:[#allocation7 + $0x118] sm:$0xff]   ;;  %v7733_v0 = vsel %vm1867_vm5, %v1877_v2, %v1879_v28 }
 0x1d9   :  { %6015 = vmatprep.mubr.bf16.mxu0 %v3938_v55  ;;  %v8197_v55 = vld [vmem:[#allocation42_spill] sm:$0xff] }
 0x1da   :  { %v3963_v60 = vrot.slane %v8197_v55, 6 }
 0x1dc   :  { %v3965_v13 = vor.u32 %v3964_v45, %v3963_v60  ;;  %v8205_v45 = vld [vmem:[#allocation50_spill] sm:$0xff] }
 0x1de   :  { %v3966_v32 = vsel %vm3867_vm4, %v3961_v63, %v3965_v13 }
 0x1df   :  { %5664 = vmatmul.mubr.bf16.vlgmr.msra.gmra.mrb[0].mxu1 %v7700_v52 }
 0x1e0   :  { %6016 = vmatmul.mubr.bf16.gmra.mrb[32].mxu0 %v3942_v44  ;;  %6135 = vmatpush3.bf16.msra.mxu1 %v7563_v35  ;;  %v8193_v35 = vld [vmem:[#allocation38_spill] sm:$0xff]  ;;  %v6793_v44 = vld [vmem:[#allocation7 + $0x120] sm:$0xff]  }
 0x1e1   :  { %5667 = vmatprep.mubr.bf16.mxu1 %v7706_v34  ;;  %6019 = vmatprep.mubr.bf16.mxu0 %v3946_v42  ;;  %v3955_v59 = vrot.slane %v8193_v35, 6  ;;  %v1885_v42 = vrot.slane %v7481_v47, 7  ;;  %v8203_v47 = vld [vmem:[#allocation47_spill] sm:$0xff] }
 0x1e2   :  { %6128 = vmatprep.subr.bf16.mxu1 %v6790_v29 }
 0x1e3   :  { %v3957_v27 = vor.u32 %v3956_v56, %v3955_v59  ;;  %v7753_v2 = vsel %vm1867_vm5, %v1883_v50, %v1885_v42  ;;  %v3970_v59 = vsel %vm3867_vm4, %v3965_v13, %v3969_v49  ;;  %v3975_v56 = vrot.slane %v8203_v47, 6  ;;  %v8208_v50 = vld [vmem:[#allocation49_spill] sm:$0xff] }
 0x1e4   :  { %6136 = vmatpush3.bf16.msra.mxu1 %v6790_v29  ;;  %v3984_v13 = vrot.slane %v8208_v50, 7 }
 0x1e5   :  { %6129 = vmatprep.subr.bf16.mxu1 %v6791_v17  ;;  %v3958_v54 = vsel %vm3867_vm4, %v3953_v21, %v3957_v27  ;;  %v3962_v38 = vsel %vm3867_vm4, %v3957_v27, %v3961_v63  ;;  %v8201_v21 = vld [vmem:[#allocation46_spill] sm:$0xff]  ;;  %v1889_v27 = vrot.slane %v7491_v33, 7  ;;  %v6796_v63 = vld [vmem:[#allocation7 + $0x138] sm:$0xff]  }
 0x1e6   :  { %v3971_v29 = vrot.slane %v8201_v21, 6  ;;  %v8207_v33 = vld [vmem:[#allocation51_spill] sm:$0xff] }
 0x1e7   :  { %5668 = vmatmul.mubr.bf16.gmra.mrb[4].mxu1 %v7717_v4  ;;  %v7769_v60 = vsel %vm1867_vm5, %v1887_v1, %v1889_v27 }
 0x1e8   :  { %6020 = vmatmul.mubr.bf16.gmra.mrb[36].mxu0 %v3950_v16  ;;  %5671 = vmatprep.mubr.bf16.mxu1 %v7721_v26  ;;  %v8202_v16 = vld [vmem:[#allocation44_spill] sm:$0xff] }
 0x1e9   :  { %6023 = vmatprep.mubr.bf16.mxu0 %v3954_v57  ;;  %6137 = vmatpush3.bf16.msra.mxu1 %v6791_v17  ;;  %v3972_v12 = vrot.slane %v8202_v16, 7  ;;  %v8204_v17 = vld [vmem:[#allocation45_spill] sm:$0xff] }
 0x1ea   :  { %6130 = vmatprep.subr.bf16.mxu1 %v6792_v9  ;;  %v3976_v57 = vrot.slane %v8204_v17, 7 }
 0x1eb   :  { %v3973_v28 = vor.u32 %v3972_v12, %v3971_v29  ;;  %v7780_v12 = vld [vmem:[#allocation5] sm:$0xff]  }
 0x1ec   :  { %v3977_v15 = vor.u32 %v3976_v57, %v3975_v56 }
 0x1ed   :  { %6138 = vmatpush3.bf16.msra.mxu1 %v6792_v9  ;;  %v7765_v9 = vsel %vm1867_vm5, %v1885_v42, %v1887_v1  ;;  %v1891_v42 = vrot.slane %v7566_v51, 7  ;;  %v8210_v1 = vld [vmem:[#allocation53_spill] sm:$0xff]  ;;  %v8211_v51 = vld [vmem:[#allocation52_spill] sm:$0xff] }
 0x1ee   :  { %6131 = vmatprep.subr.bf16.mxu1 %v6793_v44  ;;  %v3978_v61 = vsel %vm3867_vm4, %v3973_v28, %v3977_v15 }
 0x1ef   :  { %5672 = vmatmul.mubr.bf16.gmra.mrb[8].mxu1 %v7733_v0  ;;  %v7784_v56 = vsel %vm1867_vm5, %v1889_v27, %v1891_v42  ;;  %v8213_v27 = vld [vmem:[#allocation56_spill] sm:$0xff] }
 0x1f0   :  { %6024 = vmatmul.mubr.bf16.gmra.mrb[40].mxu0 %v3958_v54  ;;  %5675 = vmatprep.mubr.bf16.mxu1 %v7737_v11  ;;  %v3974_v54 = vsel %vm3867_vm4, %v3969_v49, %v3973_v28  ;;  %v3987_v28 = vrot.slane %v8210_v1, 6 }
 0x1f1   :  { %6027 = vmatprep.mubr.bf16.mxu0 %v3962_v38  ;;  %6139 = vmatpush3.bf16.msra.mxu1 %v6793_v44  ;;  %v3979_v38 = vrot.slane %v8205_v45, 6  ;;  %v3983_v44 = vrot.slane %v8207_v33, 6 }
 0x1f2   :  { %6132 = vmatprep.subr.bf16.mxu1 %v6794_v58 }
 0x1f3   :  { %v3981_v49 = vor.u32 %v3980_v23, %v3979_v38  ;;  %v3985_v29 = vor.u32 %v3984_v13, %v3983_v44  ;;  %v8212_v23 = vld [vmem:[#allocation54_spill] sm:$0xff]  ;;  %v8214_v13 = vld [vmem:[#allocation57_spill] sm:$0xff] }
 0x1f5   :  { %6140 = vmatpush3.bf16.msra.mxu1 %v6794_v58  ;;  %v8209_v58 = vld [vmem:[#allocation55_spill] sm:$0xff]  ;;  %v3982_v57 = vsel %vm3867_vm4, %v3977_v15, %v3981_v49  ;;  %v1895_v15 = vrot.slane %v8213_v27, 7 }
 0x1f6   :  { %6133 = vmatprep.subr.bf16.mxu1 %v6795_v24 }
 0x1f7   :  { %5676 = vmatmul.mubr.bf16.gmra.mrb[12].mxu1 %v7749_v39 }
 0x1f8   :  { %6028 = vmatmul.mubr.bf16.gmra.mrb[44].mxu0 %v3966_v32  ;;  %5679 = vmatprep.mubr.bf16.mxu1 %v7753_v2  ;;  %v1893_v32 = vrot.slane %v8209_v58, 7  ;;  %v8215_v58 = vld [vmem:[#allocation58_spill] sm:$0xff] }
 0x1f9   :  { %6031 = vmatprep.mubr.bf16.mxu0 %v3970_v59  ;;  %6141 = vmatpush3.bf16.msra.mxu1 %v6795_v24  ;;  %v8120_v59 = vshrl.u32 %v7780_v12, 16 }
 0x1fa   :  { %6134 = vmatprep.subr.bf16.mxu1 %v6796_v63  ;;  %v7788_v24 = vsel %vm1867_vm5, %v1891_v42, %v1893_v32  ;;  %v1897_v42 = vrot.slane %v8214_v13, 7  ;;  %v6801_v13 = vld [vmem:[#allocation2 + $0xb8] sm:$0xff]  }
 0x1fb   :  { %v3991_v38 = vrot.slane %v8120_v59, 6  ;;  %v7803_v59 = vsel %vm1867_vm5, %v1893_v32, %v1895_v15  ;;  %v1901_v32 = vrot.slane %v7600_v19, 7 }
 0x1fd   :  { %6142 = vmatpush3.bf16.msra.mxu1 %v6796_v63  ;;  %v3988_v63 = vrot.slane %v8211_v51, 7  ;;  %v3996_v51 = vshrl.u32 %v8215_v58, 16 }
 0x1ff   :  { %5680 = vmatmul.mubr.bf16.gmra.mrb[16].mxu1 %v7765_v9  ;;  %v3989_v44 = vor.u32 %v3988_v63, %v3987_v28  ;;  %v3998_v1 = vrot.slane %v3996_v51, 6  ;;  %v8216_v28 = vld [vmem:[#allocation59_spill] sm:$0xff] }
 0x200   :  { %6032 = vmatmul.mubr.bf16.gmra.mrb[48].mxu0 %v3974_v54  ;;  %5683 = vmatprep.mubr.bf16.mxu1 %v7769_v60  ;;  %v3986_v54 = vsel %vm3867_vm4, %v3981_v49, %v3985_v29  ;;  %v3999_v49 = vshll.u32 %v8215_v58, 16  ;;  %v1899_v63 = vrot.slane %v8216_v28, 7  ;;  %v6803_v28 = vld [vmem:[#allocation2 + $0xc8] sm:$0xff]  }
 0x201   :  { %6035 = vmatprep.mubr.bf16.mxu0 %v3978_v61  ;;  %v3992_v61 = vrot.slane %v8212_v23, 7  ;;  %v3990_v23 = vsel %vm3867_vm4, %v3985_v29, %v3989_v44 }
 0x202   :  { %v4001_v33 = vrot.slane %v3999_v49, 7  ;;  %v7815_v29 = vsel %vm1867_vm5, %v1897_v42, %v1899_v63  ;;  %v7819_v51 = vsel %vm1867_vm5, %v1899_v63, %v1901_v32 }
 0x203   :  { %v3993_v50 = vor.u32 %v3992_v61, %v3991_v38 }
 0x204   :  { %v4002_v38 = vor.u32 %v4001_v33, %v3998_v1  ;;  %v1905_v33 = vrot.slane %v7614_v43, 7 }
 0x206   :  { %v4003_v61 = vsel %vm3867_vm4, %v3993_v50, %v4002_v38 }
 0x207   :  { %5684 = vmatmul.mubr.bf16.gmra.mrb[20].mxu1 %v7784_v56 }
 0x208   :  { %6036 = vmatmul.mubr.bf16.gmra.mrb[52].mxu0 %v3982_v57  ;;  %5687 = vmatprep.mubr.bf16.mxu1 %v7788_v24  ;;  %v7807_v57 = vsel %vm1867_vm5, %v1895_v15, %v1897_v42 }
 0x209   :  { %6039 = vmatprep.mubr.bf16.mxu0 %v3986_v54  ;;  %v3994_v54 = vsel %vm3867_vm4, %v3989_v44, %v3993_v50  ;;  %v6798_v50 = vld [vmem:[#allocation2 + $0xa0] sm:$0xff]  }
 0x20a   :  { %v1907_v27 = vrot.slane %v6798_v50, 7 }
 0x20c   :  { %v7837_v43 = vsel %vm1867_vm5, %v1905_v33, %v1907_v27 }
 0x20f   :  { %5688 = vmatmul.mubr.bf16.gmra.mrb[24].mxu1 %v7803_v59 }
 0x210   :  { %6040 = vmatmul.mubr.bf16.gmra.mrb[56].mxu0 %v3990_v23  ;;  %5691 = vmatprep.mubr.bf16.mxu1 %v7807_v57  ;;  %v1903_v23 = vrot.slane %v7611_v5, 7  ;;  %v6799_v5 = vld [vmem:[#allocation2 + $0xa8] sm:$0xff]  }
 0x211   :  { %6043 = vmatprep.mubr.bf16.mxu0 %v3994_v54 }
 0x212   :  { %v7827_v19 = vsel %vm1867_vm5, %v1901_v32, %v1903_v23  ;;  %v7830_v1 = vsel %vm1867_vm5, %v1903_v23, %v1905_v33 }
 0x217   :  { %5692 = vmatmul.mubr.bf16.gmra.mrb[28].mxu1 %v7815_v29 }
 0x218   :  { %6044 = vmatmul.mubr.bf16.gmra.mrb[60].mxu0 %v4003_v61  ;;  %5695 = vmatprep.mubr.bf16.mxu1 %v7819_v51  ;;  %v6805_v61 = vld [vmem:[#allocation2 + $0xd8] sm:$0xff]  }
 0x219   :  { %6063 = vmatprep.mubr.bf16.mxu0 %v7700_v52  ;;  %v1909_v52 = vrot.slane %v6799_v5, 7 }
 0x21b   :  { %v7840_v15 = vsel %vm1867_vm5, %v1907_v27, %v1909_v52  ;;  %v6807_v27 = vld [vmem:[#allocation2 + $0xe8] sm:$0xff]  }
 0x21f   :  { %5696 = vmatmul.mubr.bf16.gmra.mrb[32].mxu1 %v7827_v19 }
 0x220   :  { %6064 = vmatmul.mubr.bf16.vlgmr.msra.gmra.mrb[0].mxu0 %v7706_v34  ;;  %5699 = vmatprep.mubr.bf16.mxu1 %v7830_v1  ;;  %v6800_v34 = vld [vmem:[#allocation2 + $0xb0] sm:$0xff]  }
 0x221   :  { %6067 = vmatprep.mubr.bf16.mxu0 %v7717_v4  ;;  %v1911_v44 = vrot.slane %v6800_v34, 7  ;;  %v1913_v4 = vrot.slane %v6801_v13, 7 }
 0x223   :  { %v7847_v42 = vsel %vm1867_vm5, %v1909_v52, %v1911_v44  ;;  %v7850_v49 = vsel %vm1867_vm5, %v1911_v44, %v1913_v4  ;;  %v6809_v44 = vld [vmem:[#allocation2 + $0xf8] sm:$0xff]  }
 0x227   :  { %5700 = vmatmul.mubr.bf16.gmra.mrb[36].mxu1 %v7837_v43 }
 0x228   :  { %6068 = vmatmul.mubr.bf16.gmra.mrb[4].mxu0 %v7721_v26  ;;  %5703 = vmatprep.mubr.bf16.mxu1 %v7840_v15  ;;  %v6802_v26 = vld [vmem:[#allocation2 + $0xc0] sm:$0xff]  }
 0x229   :  { %6071 = vmatprep.mubr.bf16.mxu0 %v7733_v0  ;;  %v1915_v54 = vrot.slane %v6802_v26, 7  ;;  %v1917_v0 = vrot.slane %v6803_v28, 7  ;;  %v2433_v26 = vrot.slane %v8181_v48, 7  ;;  %v2436_v28 = vrot.slane %v8183_v3, 7 }
 0x22a   :  { %v8217_v48 = vrot.slane %v8179_v30, 7  ;;  %v2442_v3 = vrot.slane %v8187_v37, 7 }
 0x22b   :  { %v7857_v63 = vsel %vm1867_vm5, %v1913_v4, %v1915_v54  ;;  %v7860_v38 = vsel %vm1867_vm5, %v1915_v54, %v1917_v0 }
 0x22f   :  { %5704 = vmatmul.mubr.bf16.gmra.mrb[40].mxu1 %v7847_v42 }
 0x230   :  { %6072 = vmatmul.mubr.bf16.gmra.mrb[8].mxu0 %v7737_v11  ;;  %5707 = vmatprep.mubr.bf16.mxu1 %v7850_v49  ;;  %v6804_v11 = vld [vmem:[#allocation2 + $0xd0] sm:$0xff]  }
 0x231   :  { %6075 = vmatprep.mubr.bf16.mxu0 %v7749_v39  ;;  %v1919_v32 = vrot.slane %v6804_v11, 7  ;;  %v1921_v39 = vrot.slane %v6805_v61, 7 }
 0x233   :  { %v7867_v23 = vsel %vm1867_vm5, %v1917_v0, %v1919_v32  ;;  %v7870_v33 = vsel %vm1867_vm5, %v1919_v32, %v1921_v39  ;;  %v2445_v32 = vrot.slane %v8189_v20, 7 }
 0x237   :  { %5708 = vmatmul.mubr.bf16.gmra.mrb[44].mxu1 %v7857_v63 }
 0x238   :  { %6076 = vmatmul.mubr.bf16.gmra.mrb[12].mxu0 %v7753_v2  ;;  %5711 = vmatprep.mubr.bf16.mxu1 %v7860_v38  ;;  %v6806_v2 = vld [vmem:[#allocation2 + $0xe0] sm:$0xff]  }
 0x239   :  { %6079 = vmatprep.mubr.bf16.mxu0 %v7765_v9  ;;  %v1923_v50 = vrot.slane %v6806_v2, 7  ;;  %v1925_v9 = vrot.slane %v6807_v27, 7 }
 0x23b   :  { %v7877_v5 = vsel %vm1867_vm5, %v1921_v39, %v1923_v50  ;;  %v7880_v52 = vsel %vm1867_vm5, %v1923_v50, %v1925_v9  ;;  %v8219_v39 = vld [vmem:[#allocation53_spill] sm:$0xff]  ;;  %v8222_v50 = vshrl.u32 %v7780_v12, 16 }
 0x23d   :  { %v2480_v27 = vrot.slane %v8222_v50, 7 }
 0x23f   :  { %5712 = vmatmul.mubr.bf16.gmra.mrb[48].mxu1 %v7867_v23 }
 0x240   :  { %6080 = vmatmul.mubr.bf16.gmra.mrb[16].mxu0 %v7769_v60  ;;  %5715 = vmatprep.mubr.bf16.mxu1 %v7870_v33  ;;  %v6808_v60 = vld [vmem:[#allocation2 + $0xf0] sm:$0xff]  }
 0x241   :  { %6083 = vmatprep.mubr.bf16.mxu0 %v7784_v56  ;;  %v1927_v34 = vrot.slane %v6808_v60, 7  ;;  %v1929_v56 = vrot.slane %v6809_v44, 7  ;;  %v4454_v60 = vrot.slane %v8215_v58, 7 }
 0x243   :  { %v7887_v13 = vsel %vm1867_vm5, %v1925_v9, %v1927_v34  ;;  %v7890_v4 = vsel %vm1867_vm5, %v1927_v34, %v1929_v56 }
 0x247   :  { %5716 = vmatmul.mubr.bf16.gmra.mrb[52].mxu1 %v7877_v5 }
 0x248   :  { %6084 = vmatmul.mubr.bf16.gmra.mrb[20].mxu0 %v7788_v24  ;;  %5719 = vmatprep.mubr.bf16.mxu1 %v7880_v52  ;;  %v1931_v24 = vrot.slane %v7780_v12, 7 }
 0x249   :  { %6087 = vmatprep.mubr.bf16.mxu0 %v7803_v59  ;;  %v2434_v59 = vor.u32 %v2433_v26, %v8182_v41  ;;  %v2437_v41 = vor.u32 %v2436_v28, %v8184_v53  ;;  %v2446_v53 = vor.u32 %v2445_v32, %v8190_v7 }
 0x24a   :  { %v7902_v54 = vsel %vm1867_vm5, %v1929_v56, %v1931_v24  ;;  %v4455_v44 = vsel %vm1867_vm5, %v1931_v24, %v4454_v60 }
 0x24b   :  { %v2435_v0 = vsel %vm2383_vm1, %v8217_v48, %v2434_v59  ;;  %v2438_v11 = vsel %vm2383_vm1, %v2433_v26, %v2437_v41  ;;  %v2447_v37 = vsel %vm2383_vm1, %v2442_v3, %v2446_v53 }
 0x24f   :  { %5720 = vmatmul.mubr.bf16.gmra.mrb[56].mxu1 %v7887_v13 }
 0x250   :  { %6088 = vmatmul.mubr.bf16.gmra.mrb[24].mxu0 %v7807_v57  ;;  %5723 = vmatprep.mubr.bf16.mxu1 %v7890_v4  ;;  %v2439_v57 = vrot.slane %v8185_v6, 7  ;;  %v2443_v6 = vor.u32 %v2442_v3, %v8188_v31 }
 0x251   :  { %6091 = vmatprep.mubr.bf16.mxu0 %v7815_v29 }
 0x252   :  { %v2440_v29 = vor.u32 %v2439_v57, %v8186_v10  ;;  %v2444_v10 = vsel %vm2383_vm1, %v2439_v57, %v2443_v6 }
 0x254   :  { %v2441_v30 = vsel %vm2383_vm1, %v2436_v28, %v2440_v29 }
 0x257   :  { %5724 = vmatmul.mubr.bf16.gmra.mrb[60].mxu1 %v7902_v54 }
 0x258   :  { %6092 = vmatmul.mubr.bf16.gmra.mrb[28].mxu0 %v7819_v51  ;;  %5775 = vmatprep.mubr.bf16.mxu1 %v2435_v0  ;;  %v2448_v51 = vrot.slane %v8191_v62, 7 }
 0x259   :  { %6095 = vmatprep.mubr.bf16.mxu0 %v7827_v19  ;;  %v2451_v19 = vrot.slane %v8193_v35, 7 }
 0x25a   :  { %v2449_v20 = vor.u32 %v2448_v51, %v8192_v14 }
 0x25b   :  { %v2452_v31 = vor.u32 %v2451_v19, %v8194_v18 }
 0x25c   :  { %v2450_v7 = vsel %vm2383_vm1, %v2445_v32, %v2449_v20 }
 0x25d   :  { %v2453_v62 = vsel %vm2383_vm1, %v2448_v51, %v2452_v31 }
 0x25f   :  { %5776 = vmatmul.mubr.bf16.vlgmr.msra.gmra.mrb[32].mxu1 %v2438_v11 }
 0x260   :  { %6096 = vmatmul.mubr.bf16.gmra.mrb[32].mxu0 %v7830_v1  ;;  %5779 = vmatprep.mubr.bf16.mxu1 %v2441_v30  ;;  %v2454_v1 = vrot.slane %v8195_v8, 7 }
 0x261   :  { %6099 = vmatprep.mubr.bf16.mxu0 %v7837_v43  ;;  %v2457_v43 = vrot.slane %v8197_v55, 7 }
 0x262   :  { %v2455_v35 = vor.u32 %v2454_v1, %v8196_v22 }
 0x263   :  { %v2458_v14 = vor.u32 %v2457_v43, %v8198_v46 }
 0x264   :  { %v2456_v18 = vsel %vm2383_vm1, %v2451_v19, %v2455_v35 }
 0x265   :  { %v2459_v8 = vsel %vm2383_vm1, %v2454_v1, %v2458_v14 }
 0x267   :  { %5780 = vmatmul.mubr.bf16.gmra.mrb[36].mxu1 %v2444_v10 }
 0x268   :  { %6100 = vmatmul.mubr.bf16.gmra.mrb[36].mxu0 %v7840_v15  ;;  %5783 = vmatprep.mubr.bf16.mxu1 %v2447_v37  ;;  %v2460_v15 = vrot.slane %v8199_v25, 7 }
 0x269   :  { %6103 = vmatprep.mubr.bf16.mxu0 %v7847_v42  ;;  %v2463_v42 = vrot.slane %v8201_v21, 7 }
 0x26a   :  { %v2461_v55 = vor.u32 %v2460_v15, %v8200_v36 }
 0x26b   :  { %v2464_v22 = vor.u32 %v2463_v42, %v8202_v16 }
 0x26c   :  { %v2462_v46 = vsel %vm2383_vm1, %v2457_v43, %v2461_v55 }
 0x26d   :  { %v2465_v25 = vsel %vm2383_vm1, %v2460_v15, %v2464_v22 }
 0x26f   :  { %5784 = vmatmul.mubr.bf16.gmra.mrb[40].mxu1 %v2450_v7 }
 0x270   :  { %6104 = vmatmul.mubr.bf16.gmra.mrb[40].mxu0 %v7850_v49  ;;  %5787 = vmatprep.mubr.bf16.mxu1 %v2453_v62  ;;  %v2466_v49 = vrot.slane %v8203_v47, 7 }
 0x271   :  { %6107 = vmatprep.mubr.bf16.mxu0 %v7857_v63  ;;  %v2469_v63 = vrot.slane %v8205_v45, 7  ;;  %v8220_v45 = vld [vmem:[#allocation49_spill] sm:$0xff] }
 0x272   :  { %v2467_v21 = vor.u32 %v2466_v49, %v8204_v17  ;;  %v8221_v17 = vld [vmem:[#allocation52_spill] sm:$0xff] }
 0x273   :  { %v2470_v36 = vor.u32 %v2469_v63, %v8206_v40 }
 0x274   :  { %v2468_v16 = vsel %vm2383_vm1, %v2463_v42, %v2467_v21 }
 0x275   :  { %v2471_v47 = vsel %vm2383_vm1, %v2466_v49, %v2470_v36 }
 0x277   :  { %5788 = vmatmul.mubr.bf16.gmra.mrb[44].mxu1 %v2456_v18 }
 0x278   :  { %6108 = vmatmul.mubr.bf16.gmra.mrb[44].mxu0 %v7860_v38  ;;  %5791 = vmatprep.mubr.bf16.mxu1 %v2459_v8  ;;  %v8218_v38 = vld [vmem:[#allocation51_spill] sm:$0xff] }
 0x279   :  { %6111 = vmatprep.mubr.bf16.mxu0 %v7867_v23  ;;  %v2472_v61 = vrot.slane %v8218_v38, 7  ;;  %v2475_v23 = vrot.slane %v8219_v39, 7 }
 0x27b   :  { %v2476_v2 = vor.u32 %v2475_v23, %v8221_v17 }
 0x27d   :  { %v2477_v9 = vsel %vm2383_vm1, %v2472_v61, %v2476_v2 }
 0x27f   :  { %5792 = vmatmul.mubr.bf16.gmra.mrb[48].mxu1 %v2462_v46 }
 0x280   :  { %6112 = vmatmul.mubr.bf16.gmra.mrb[48].mxu0 %v7870_v33  ;;  %5795 = vmatprep.mubr.bf16.mxu1 %v2465_v25  ;;  %v2473_v33 = vor.u32 %v2472_v61, %v8220_v45 }
 0x281   :  { %6115 = vmatprep.mubr.bf16.mxu0 %v7877_v5  ;;  %v8223_v5 = vld [vmem:[#allocation54_spill] sm:$0xff] }
 0x282   :  { %v2474_v40 = vsel %vm2383_vm1, %v2469_v63, %v2473_v33 }
 0x287   :  { %5796 = vmatmul.mubr.bf16.gmra.mrb[52].mxu1 %v2468_v16 }
 0x288   :  { %6116 = vmatmul.mubr.bf16.gmra.mrb[52].mxu0 %v7880_v52  ;;  %5799 = vmatprep.mubr.bf16.mxu1 %v2471_v47  ;;  %v2481_v52 = vor.u32 %v2480_v27, %v8223_v5 }
 0x289   :  { %6119 = vmatprep.mubr.bf16.mxu0 %v7887_v13 }
 0x28a   :  { %v2482_v34 = vsel %vm2383_vm1, %v2475_v23, %v2481_v52 }
 0x28f   :  { %5800 = vmatmul.mubr.bf16.gmra.mrb[56].mxu1 %v2474_v40 }
 0x290   :  { %6120 = vmatmul.mubr.bf16.gmra.mrb[56].mxu0 %v7890_v4  ;;  %5803 = vmatprep.mubr.bf16.mxu1 %v2477_v9 }
 0x291   :  { %6123 = vmatprep.mubr.bf16.mxu0 %v7902_v54 }
 0x297   :  { %5804 = vmatmul.mubr.bf16.gmra.mrb[60].mxu1 %v2482_v34 }
 0x298   :  { %6124 = vmatmul.mubr.bf16.gmra.mrb[60].mxu0 %v4455_v44 }
 0x2b2   :  { %v5665_v56 = vpop.f32.mrb[0].mxu1 }
 0x2b3   :  { %v2047_v13 = vpop.f32.mrb[1].mxu1 }
 0x2b4   :  { %v5666_v26 = vpop.f32.mrb[2].mxu1 }
 0x2b5   :  { %v2050_v59 = vpop.f32.mrb[3].mxu1 }
 0x2ba   :  { %v5669_v4 = vpop.f32.mrb[4].mxu1 }
 0x2bb   :  { %v2063_v28 = vpop.f32.mrb[5].mxu1 }
 0x2bc   :  { %v5670_v48 = vpop.f32.mrb[6].mxu1 }
 0x2bd   :  { %v2066_v0 = vpop.f32.mrb[7].mxu1 }
 0x2c2   :  { %v5673_v57 = vpop.f32.mrb[8].mxu1 }
 0x2c3   :  { %v2079_v54 = vpop.f32.mrb[9].mxu1 }
 0x2c4   :  { %v5674_v41 = vpop.f32.mrb[10].mxu1 }
 0x2c5   :  { %v2082_v58 = vpop.f32.mrb[11].mxu1 }
 0x2ca   :  { %v5677_v29 = vpop.f32.mrb[12].mxu1 }
 0x2cb   :  { %v2095_v11 = vpop.f32.mrb[13].mxu1 }
 0x2cc   :  { %v5678_v3 = vpop.f32.mrb[14].mxu1 }
 0x2cd   :  { %v2098_v12 = vpop.f32.mrb[15].mxu1 }
 0x2d2   :  { %v7974_v30 = vpop.f32.mrb[16].mxu1 }
 0x2d3   :  { %v7976_v24 = vpop.f32.mrb[17].mxu1 }
 0x2d4   :  { %v7978_v32 = vpop.f32.mrb[18].mxu1 }
 0x2d5   :  { %v7980_v6 = vpop.f32.mrb[19].mxu1 }
 0x2da   :  { %v7982_v53 = vpop.f32.mrb[20].mxu1 }
 0x2db   :  { %v7984_v10 = vpop.f32.mrb[21].mxu1 }
 0x2dc   :  { %v7986_v51 = vpop.f32.mrb[22].mxu1 }
 0x2dd   :  { %v7988_v37 = vpop.f32.mrb[23].mxu1 }
 0x2e2   :  { %v7990_v19 = vpop.f32.mrb[24].mxu1 }
 0x2e3   :  { %v7992_v20 = vpop.f32.mrb[25].mxu1 }
 0x2e4   :  { %v7994_v31 = vpop.f32.mrb[26].mxu1 }
 0x2e5   :  { %v7996_v7 = vpop.f32.mrb[27].mxu1 }
 0x2ea   :  { %v7998_v1 = vpop.f32.mrb[28].mxu1 }
 0x2eb   :  { %v8000_v62 = vpop.f32.mrb[29].mxu1 }
 0x2ec   :  { %v8002_v43 = vpop.f32.mrb[30].mxu1 }
 0x2ed   :  { %v8004_v35 = vpop.f32.mrb[31].mxu1 }
 0x2f3   :  { %v6065_v14 = vpop.f32.mrb[0].mxu0 }
 0x2f4   :  { %v6143_v18 = vadd.f32 %v6065_v14, %v5665_v56  ;;  %v4539_v15 = vpop.f32.mrb[1].mxu0 }
 0x2f5   :  { %v6144_v8 = vadd.f32 %v4539_v15, %v2047_v13  ;;  %v6066_v42 = vpop.f32.mrb[2].mxu0 }
 0x2f6   :  { %4860 = vst [vmem:[#allocation8 + $0x10] sm:$0xff] %v6143_v18  ;;  %v6145_v55 = vadd.f32 %v6066_v42, %v5666_v26  ;;  %v4542_v22 = vpop.f32.mrb[3].mxu0 }
 0x2f7   :  { %4858 = vst [vmem:[#allocation8] sm:$0xff] %v6144_v8  ;;  %v6146_v46 = vadd.f32 %v4542_v22, %v2050_v59 }
 0x2f8   :  { %4861 = vst [vmem:[#allocation8 + $0x18] sm:$0xff] %v6145_v55 }
 0x2f9   :  { %4859 = vst [vmem:[#allocation8 + $0x8] sm:$0xff] %v6146_v46 }
 0x2fb   :  { %v6069_v49 = vpop.f32.mrb[4].mxu0 }
 0x2fc   :  { %v6147_v25 = vadd.f32 %v6069_v49, %v5669_v4  ;;  %v4555_v63 = vpop.f32.mrb[5].mxu0 }
 0x2fd   :  { %v6148_v21 = vadd.f32 %v4555_v63, %v2063_v28  ;;  %v6070_v36 = vpop.f32.mrb[6].mxu0 }
 0x2fe   :  { %4864 = vst [vmem:[#allocation8 + $0x30] sm:$0xff] %v6147_v25  ;;  %v6149_v16 = vadd.f32 %v6070_v36, %v5670_v48  ;;  %v4558_v38 = vpop.f32.mrb[7].mxu0 }
 0x2ff   :  { %4862 = vst [vmem:[#allocation8 + $0x20] sm:$0xff] %v6148_v21  ;;  %v6150_v61 = vadd.f32 %v4558_v38, %v2066_v0 }
 0x300   :  { %4865 = vst [vmem:[#allocation8 + $0x38] sm:$0xff] %v6149_v16 }
 0x301   :  { %4863 = vst [vmem:[#allocation8 + $0x28] sm:$0xff] %v6150_v61 }
 0x303   :  { %v6073_v47 = vpop.f32.mrb[8].mxu0 }
 0x304   :  { %v6151_v39 = vadd.f32 %v6073_v47, %v5673_v57  ;;  %v4571_v23 = vpop.f32.mrb[9].mxu0 }
 0x305   :  { %v6152_v45 = vadd.f32 %v4571_v23, %v2079_v54  ;;  %v6074_v33 = vpop.f32.mrb[10].mxu0 }
 0x306   :  { %4868 = vst [vmem:[#allocation8 + $0x50] sm:$0xff] %v6151_v39  ;;  %v6153_v17 = vadd.f32 %v6074_v33, %v5674_v41  ;;  %v4574_v2 = vpop.f32.mrb[11].mxu0 }
 0x307   :  { %4866 = vst [vmem:[#allocation8 + $0x40] sm:$0xff] %v6152_v45  ;;  %v6154_v40 = vadd.f32 %v4574_v2, %v2082_v58 }
 0x308   :  { %4869 = vst [vmem:[#allocation8 + $0x58] sm:$0xff] %v6153_v17 }
 0x309   :  { %4867 = vst [vmem:[#allocation8 + $0x48] sm:$0xff] %v6154_v40 }
 0x30b   :  { %v6077_v50 = vpop.f32.mrb[12].mxu0 }
 0x30c   :  { %v6155_v27 = vadd.f32 %v6077_v50, %v5677_v29  ;;  %v4587_v9 = vpop.f32.mrb[13].mxu0 }
 0x30d   :  { %v6156_v5 = vadd.f32 %v4587_v9, %v2095_v11  ;;  %v6078_v52 = vpop.f32.mrb[14].mxu0 }
 0x30e   :  { %4872 = vst [vmem:[#allocation8 + $0x70] sm:$0xff] %v6155_v27  ;;  %v6157_v60 = vadd.f32 %v6078_v52, %v5678_v3  ;;  %v4590_v34 = vpop.f32.mrb[15].mxu0 }
 0x30f   :  { %4870 = vst [vmem:[#allocation8 + $0x60] sm:$0xff] %v6156_v5  ;;  %v6158_v44 = vadd.f32 %v4590_v34, %v2098_v12 }
 0x310   :  { %4873 = vst [vmem:[#allocation8 + $0x78] sm:$0xff] %v6157_v60 }
 0x311   :  { %4871 = vst [vmem:[#allocation8 + $0x68] sm:$0xff] %v6158_v44 }
 0x313   :  { %v6081_v56 = vpop.f32.mrb[16].mxu0 }
 0x314   :  { %v6159_v13 = vadd.f32 %v6081_v56, %v7974_v30  ;;  %v4603_v26 = vpop.f32.mrb[17].mxu0 }
 0x315   :  { %v6160_v59 = vadd.f32 %v4603_v26, %v7976_v24  ;;  %v6082_v4 = vpop.f32.mrb[18].mxu0 }
 0x316   :  { %4876 = vst [vmem:[#allocation8 + $0x90] sm:$0xff] %v6159_v13  ;;  %v6161_v28 = vadd.f32 %v6082_v4, %v7978_v32  ;;  %v4606_v48 = vpop.f32.mrb[19].mxu0 }
 0x317   :  { %4874 = vst [vmem:[#allocation8 + $0x80] sm:$0xff] %v6160_v59  ;;  %v6162_v0 = vadd.f32 %v4606_v48, %v7980_v6 }
 0x318   :  { %4877 = vst [vmem:[#allocation8 + $0x98] sm:$0xff] %v6161_v28 }
 0x319   :  { %4875 = vst [vmem:[#allocation8 + $0x88] sm:$0xff] %v6162_v0 }
 0x31b   :  { %v6085_v57 = vpop.f32.mrb[20].mxu0 }
 0x31c   :  { %v6163_v54 = vadd.f32 %v6085_v57, %v7982_v53  ;;  %v4619_v41 = vpop.f32.mrb[21].mxu0 }
 0x31d   :  { %v6164_v58 = vadd.f32 %v4619_v41, %v7984_v10  ;;  %v6086_v29 = vpop.f32.mrb[22].mxu0 }
 0x31e   :  { %4880 = vst [vmem:[#allocation8 + $0xb0] sm:$0xff] %v6163_v54  ;;  %v6165_v11 = vadd.f32 %v6086_v29, %v7986_v51  ;;  %v4622_v3 = vpop.f32.mrb[23].mxu0 }
 0x31f   :  { %4878 = vst [vmem:[#allocation8 + $0xa0] sm:$0xff] %v6164_v58  ;;  %v6166_v12 = vadd.f32 %v4622_v3, %v7988_v37 }
 0x320   :  { %4881 = vst [vmem:[#allocation8 + $0xb8] sm:$0xff] %v6165_v11 }
 0x321   :  { %4879 = vst [vmem:[#allocation8 + $0xa8] sm:$0xff] %v6166_v12 }
 0x323   :  { %v6089_v30 = vpop.f32.mrb[24].mxu0 }
 0x324   :  { %v6167_v24 = vadd.f32 %v6089_v30, %v7990_v19  ;;  %v4635_v32 = vpop.f32.mrb[25].mxu0 }
 0x325   :  { %v6168_v6 = vadd.f32 %v4635_v32, %v7992_v20  ;;  %v6090_v53 = vpop.f32.mrb[26].mxu0 }
 0x326   :  { %4884 = vst [vmem:[#allocation8 + $0xd0] sm:$0xff] %v6167_v24  ;;  %v6169_v10 = vadd.f32 %v6090_v53, %v7994_v31  ;;  %v4638_v14 = vpop.f32.mrb[27].mxu0 }
 0x327   :  { %4882 = vst [vmem:[#allocation8 + $0xc0] sm:$0xff] %v6168_v6  ;;  %v6170_v51 = vadd.f32 %v4638_v14, %v7996_v7 }
 0x328   :  { %4885 = vst [vmem:[#allocation8 + $0xd8] sm:$0xff] %v6169_v10 }
 0x329   :  { %4883 = vst [vmem:[#allocation8 + $0xc8] sm:$0xff] %v6170_v51 }
 0x32b   :  { %v6093_v18 = vpop.f32.mrb[28].mxu0 }
 0x32c   :  { %v6171_v37 = vadd.f32 %v6093_v18, %v7998_v1  ;;  %v4651_v15 = vpop.f32.mrb[29].mxu0 }
 0x32d   :  { %v6172_v8 = vadd.f32 %v4651_v15, %v8000_v62  ;;  %v6094_v19 = vpop.f32.mrb[30].mxu0 }
 0x32e   :  { %4888 = vst [vmem:[#allocation8 + $0xf0] sm:$0xff] %v6171_v37  ;;  %v6173_v20 = vadd.f32 %v6094_v19, %v8002_v43  ;;  %v4654_v42 = vpop.f32.mrb[31].mxu0 }
 0x32f   :  { %4886 = vst [vmem:[#allocation8 + $0xe0] sm:$0xff] %v6172_v8  ;;  %v6174_v31 = vadd.f32 %v4654_v42, %v8004_v35 }
 0x330   :  { %4889 = vst [vmem:[#allocation8 + $0xf8] sm:$0xff] %v6173_v20 }
 0x331   :  { %4887 = vst [vmem:[#allocation8 + $0xe8] sm:$0xff] %v6174_v31 }
 0x332   :  { %v5777_v55 = vpop.f32.mrb[32].mxu1 }
 0x333   :  { %v6097_v7 = vpop.f32.mrb[32].mxu0  ;;  %v2725_v22 = vpop.f32.mrb[33].mxu1 }
 0x334   :  { %v6175_v46 = vadd.f32 %v6097_v7, %v5777_v55  ;;  %v4667_v49 = vpop.f32.mrb[33].mxu0  ;;  %v5778_v25 = vpop.f32.mrb[34].mxu1 }
 0x335   :  { %v6176_v1 = vadd.f32 %v4667_v49, %v2725_v22  ;;  %v6098_v63 = vpop.f32.mrb[34].mxu0  ;;  %v2728_v21 = vpop.f32.mrb[35].mxu1 }
 0x336   :  { %4892 = vst [vmem:[#allocation8 + $0x110] sm:$0xff] %v6175_v46  ;;  %v6177_v62 = vadd.f32 %v6098_v63, %v5778_v25  ;;  %v4670_v36 = vpop.f32.mrb[35].mxu0 }
 0x337   :  { %4890 = vst [vmem:[#allocation8 + $0x100] sm:$0xff] %v6176_v1  ;;  %v6178_v43 = vadd.f32 %v4670_v36, %v2728_v21 }
 0x338   :  { %4893 = vst [vmem:[#allocation8 + $0x118] sm:$0xff] %v6177_v62 }
 0x339   :  { %4891 = vst [vmem:[#allocation8 + $0x108] sm:$0xff] %v6178_v43 }
 0x33a   :  { %v5781_v16 = vpop.f32.mrb[36].mxu1 }
 0x33b   :  { %v6101_v35 = vpop.f32.mrb[36].mxu0  ;;  %v2741_v38 = vpop.f32.mrb[37].mxu1 }
 0x33c   :  { %v6179_v61 = vadd.f32 %v6101_v35, %v5781_v16  ;;  %v4683_v47 = vpop.f32.mrb[37].mxu0  ;;  %v5782_v39 = vpop.f32.mrb[38].mxu1 }
 0x33d   :  { %v6180_v23 = vadd.f32 %v4683_v47, %v2741_v38  ;;  %v6102_v45 = vpop.f32.mrb[38].mxu0  ;;  %v2744_v33 = vpop.f32.mrb[39].mxu1 }
 0x33e   :  { %4896 = vst [vmem:[#allocation8 + $0x130] sm:$0xff] %v6179_v61  ;;  %v6181_v17 = vadd.f32 %v6102_v45, %v5782_v39  ;;  %v4686_v2 = vpop.f32.mrb[39].mxu0 }
 0x33f   :  { %4894 = vst [vmem:[#allocation8 + $0x120] sm:$0xff] %v6180_v23  ;;  %v6182_v40 = vadd.f32 %v4686_v2, %v2744_v33 }
 0x340   :  { %4897 = vst [vmem:[#allocation8 + $0x138] sm:$0xff] %v6181_v17 }
 0x341   :  { %4895 = vst [vmem:[#allocation8 + $0x128] sm:$0xff] %v6182_v40 }
 0x342   :  { %v5785_v50 = vpop.f32.mrb[40].mxu1 }
 0x343   :  { %v6105_v27 = vpop.f32.mrb[40].mxu0  ;;  %v2757_v9 = vpop.f32.mrb[41].mxu1 }
 0x344   :  { %v6183_v5 = vadd.f32 %v6105_v27, %v5785_v50  ;;  %v4699_v52 = vpop.f32.mrb[41].mxu0  ;;  %v5786_v60 = vpop.f32.mrb[42].mxu1 }
 0x345   :  { %v6184_v34 = vadd.f32 %v4699_v52, %v2757_v9  ;;  %v6106_v44 = vpop.f32.mrb[42].mxu0  ;;  %v2760_v56 = vpop.f32.mrb[43].mxu1 }
 0x346   :  { %4900 = vst [vmem:[#allocation8 + $0x150] sm:$0xff] %v6183_v5  ;;  %v6185_v13 = vadd.f32 %v6106_v44, %v5786_v60  ;;  %v4702_v26 = vpop.f32.mrb[43].mxu0 }
 0x347   :  { %4898 = vst [vmem:[#allocation8 + $0x140] sm:$0xff] %v6184_v34  ;;  %v6186_v59 = vadd.f32 %v4702_v26, %v2760_v56 }
 0x348   :  { %4901 = vst [vmem:[#allocation8 + $0x158] sm:$0xff] %v6185_v13 }
 0x349   :  { %4899 = vst [vmem:[#allocation8 + $0x148] sm:$0xff] %v6186_v59 }
 0x34a   :  { %v5789_v4 = vpop.f32.mrb[44].mxu1 }
 0x34b   :  { %v6109_v28 = vpop.f32.mrb[44].mxu0  ;;  %v2773_v48 = vpop.f32.mrb[45].mxu1 }
 0x34c   :  { %v6187_v0 = vadd.f32 %v6109_v28, %v5789_v4  ;;  %v4715_v57 = vpop.f32.mrb[45].mxu0  ;;  %v5790_v54 = vpop.f32.mrb[46].mxu1 }
 0x34d   :  { %v6188_v41 = vadd.f32 %v4715_v57, %v2773_v48  ;;  %v6110_v58 = vpop.f32.mrb[46].mxu0  ;;  %v2776_v29 = vpop.f32.mrb[47].mxu1 }
 0x34e   :  { %4904 = vst [vmem:[#allocation8 + $0x170] sm:$0xff] %v6187_v0  ;;  %v6189_v11 = vadd.f32 %v6110_v58, %v5790_v54  ;;  %v4718_v3 = vpop.f32.mrb[47].mxu0 }
 0x34f   :  { %4902 = vst [vmem:[#allocation8 + $0x160] sm:$0xff] %v6188_v41  ;;  %v6190_v12 = vadd.f32 %v4718_v3, %v2776_v29 }
 0x350   :  { %4905 = vst [vmem:[#allocation8 + $0x178] sm:$0xff] %v6189_v11 }
 0x351   :  { %4903 = vst [vmem:[#allocation8 + $0x168] sm:$0xff] %v6190_v12 }
 0x352   :  { %v5793_v30 = vpop.f32.mrb[48].mxu1 }
 0x353   :  { %v6113_v24 = vpop.f32.mrb[48].mxu0  ;;  %v2789_v32 = vpop.f32.mrb[49].mxu1 }
 0x354   :  { %v6191_v6 = vadd.f32 %v6113_v24, %v5793_v30  ;;  %v4731_v53 = vpop.f32.mrb[49].mxu0  ;;  %v5794_v10 = vpop.f32.mrb[50].mxu1 }
 0x355   :  { %v6192_v14 = vadd.f32 %v4731_v53, %v2789_v32  ;;  %v6114_v51 = vpop.f32.mrb[50].mxu0  ;;  %v2792_v18 = vpop.f32.mrb[51].mxu1 }
 0x356   :  { %4908 = vst [vmem:[#allocation8 + $0x190] sm:$0xff] %v6191_v6  ;;  %v6193_v37 = vadd.f32 %v6114_v51, %v5794_v10  ;;  %v4734_v15 = vpop.f32.mrb[51].mxu0 }
 0x357   :  { %4906 = vst [vmem:[#allocation8 + $0x180] sm:$0xff] %v6192_v14  ;;  %v6194_v8 = vadd.f32 %v4734_v15, %v2792_v18 }
 0x358   :  { %4909 = vst [vmem:[#allocation8 + $0x198] sm:$0xff] %v6193_v37 }
 0x359   :  { %4907 = vst [vmem:[#allocation8 + $0x188] sm:$0xff] %v6194_v8 }
 0x35a   :  { %v5797_v19 = vpop.f32.mrb[52].mxu1 }
 0x35b   :  { %v6117_v20 = vpop.f32.mrb[52].mxu0  ;;  %v2805_v42 = vpop.f32.mrb[53].mxu1 }
 0x35c   :  { %v6195_v31 = vadd.f32 %v6117_v20, %v5797_v19  ;;  %v4747_v55 = vpop.f32.mrb[53].mxu0  ;;  %v5798_v7 = vpop.f32.mrb[54].mxu1 }
 0x35d   :  { %v6196_v22 = vadd.f32 %v4747_v55, %v2805_v42  ;;  %v6118_v46 = vpop.f32.mrb[54].mxu0  ;;  %v2808_v49 = vpop.f32.mrb[55].mxu1 }
 0x35e   :  { %4912 = vst [vmem:[#allocation8 + $0x1b0] sm:$0xff] %v6195_v31  ;;  %v6197_v25 = vadd.f32 %v6118_v46, %v5798_v7  ;;  %v4750_v1 = vpop.f32.mrb[55].mxu0 }
 0x35f   :  { %4910 = vst [vmem:[#allocation8 + $0x1a0] sm:$0xff] %v6196_v22  ;;  %v6198_v63 = vadd.f32 %v4750_v1, %v2808_v49 }
 0x360   :  { %4913 = vst [vmem:[#allocation8 + $0x1b8] sm:$0xff] %v6197_v25 }
 0x361   :  { %4911 = vst [vmem:[#allocation8 + $0x1a8] sm:$0xff] %v6198_v63 }
 0x362   :  { %v5801_v21 = vpop.f32.mrb[56].mxu1 }
 0x363   :  { %v6121_v62 = vpop.f32.mrb[56].mxu0  ;;  %v2821_v36 = vpop.f32.mrb[57].mxu1 }
 0x364   :  { %v6199_v43 = vadd.f32 %v6121_v62, %v5801_v21  ;;  %v4763_v16 = vpop.f32.mrb[57].mxu0  ;;  %v5802_v35 = vpop.f32.mrb[58].mxu1 }
 0x365   :  { %v6200_v38 = vadd.f32 %v4763_v16, %v2821_v36  ;;  %v6122_v61 = vpop.f32.mrb[58].mxu0  ;;  %v2824_v47 = vpop.f32.mrb[59].mxu1 }
 0x366   :  { %4916 = vst [vmem:[#allocation8 + $0x1d0] sm:$0xff] %v6199_v43  ;;  %v6201_v39 = vadd.f32 %v6122_v61, %v5802_v35  ;;  %v4766_v23 = vpop.f32.mrb[59].mxu0 }
 0x367   :  { %4914 = vst [vmem:[#allocation8 + $0x1c0] sm:$0xff] %v6200_v38  ;;  %v6202_v45 = vadd.f32 %v4766_v23, %v2824_v47 }
 0x368   :  { %4917 = vst [vmem:[#allocation8 + $0x1d8] sm:$0xff] %v6201_v39 }
 0x369   :  { %4915 = vst [vmem:[#allocation8 + $0x1c8] sm:$0xff] %v6202_v45 }
 0x36a   :  { %v5805_v33 = vpop.f32.mrb[60].mxu1 }
 0x36b   :  { %v6125_v17 = vpop.f32.mrb[60].mxu0  ;;  %v2837_v2 = vpop.f32.mrb[61].mxu1 }
 0x36c   :  { %v6203_v40 = vadd.f32 %v6125_v17, %v5805_v33  ;;  %v4779_v50 = vpop.f32.mrb[61].mxu0  ;;  %v5806_v27 = vpop.f32.mrb[62].mxu1 }
 0x36d   :  { %v6204_v9 = vadd.f32 %v4779_v50, %v2837_v2  ;;  %v6126_v5 = vpop.f32.mrb[62].mxu0  ;;  %v2840_v52 = vpop.f32.mrb[63].mxu1 }
 0x36e   :  { %4920 = vst [vmem:[#allocation8 + $0x1f0] sm:$0xff] %v6203_v40  ;;  %v6205_v60 = vadd.f32 %v6126_v5, %v5806_v27  ;;  %v4782_v34 = vpop.f32.mrb[63].mxu0 }
 0x36f   :  { %4918 = vst [vmem:[#allocation8 + $0x1e0] sm:$0xff] %v6204_v9  ;;  %v6206_v44 = vadd.f32 %v4782_v34, %v2840_v52 }
 0x370   :  { %4921 = vst [vmem:[#allocation8 + $0x1f8] sm:$0xff] %v6205_v60 }
 0x371   :  { %4919 = vst [vmem:[#allocation8 + $0x1e8] sm:$0xff] %v6206_v44 }
 0x372   :  { %6890 = shalt.err (!%p6887_p6)
}
 0x373   :  { %s6891_s1 = scalar_lea.hbm %s8037_s3, 8192 }
 0x374   :  { %p6892_p7 = scmp.ne.s32.totalorder %s8037_s3, %s6891_s1  ;;  %p6895_p8 = scmp.lt.u32.totalorder %s6891_s1, %s8037_s3 }
 0x376   :  { %p6897_p9 = pnand %p6895_p8, %p6892_p7 }
 0x378   :  { %6900 = shalt.err (!%p6897_p9)
}
 0x379   :  { %s6913_s4 = smov 128   ;;  %s6914_s5 = smov 8  }
 0x37a   :  { %4933 = dma.vmem_to_hbm [thread:$0]  %s4928_s23, 8192, %s8037_s3, [#allocation4], %s6913_s4, %s6913_s4, %s6914_s5  }
 0x37b   :  { %6905 = dma.done.wait [#allocation4], 8192  }
 0x37c   :  { %6906 = vsyncadd [#allocation4], 4294959104 }
 0x37d   :  { %4937 = vsyncpa [#allocation3], 1 }
 0x37e   :  { %4938 = vsyncpa [#allocation6], 1 }
 0x37f   :  { %4939 = vsyncpa [#allocation4], 1 }

</bundles_post_ra>
